<compile_context>
chip_gen: v6e
topology: v6e:2x2x1
jax: 0.10.0
libtpu: 0.0.40
codegen_flags: <defaults>
</compile_context>

<pallas_src>
import numpy as np
import jax
import jax.numpy as jnp
from jax.experimental import pallas as pl
from jax.experimental.pallas import tpu as pltpu

# ---- module hyper-parameters (defaults of GABlock) ----
NODE_FEAT_DIM = 32
PAIR_FEAT_DIM = 16
VALUE_DIM = 32
QUERY_KEY_DIM = 32
NUM_QUERY_POINTS = 8
NUM_VALUE_POINTS = 8
NUM_HEADS = 12
INF = 100000.0
LN_EPS = 1e-5  # TODO(synk): diffab's custom LayerNorm eps may differ slightly.

H, D, V = NUM_HEADS, QUERY_KEY_DIM, VALUE_DIM
QP, VP = NUM_QUERY_POINTS, NUM_VALUE_POINTS
C = PAIR_FEAT_DIM

GROUP_W = H * D            # 384: padded column-group width of the fused projection
PROJ_WIDTHS = (H * D, H * D, H * V, H * QP * 3, H * QP * 3, H * VP * 3)
QK_CAT = D + 3 * QP        # 56: [q | sqrt2*qs] width
VAL_CAT = V + 3 * VP       # 56: [v | vp] width
ATTN_OUT_W = 128           # lane-dense packed attention output width
VMEM_LIMIT = 64 * 1024 * 1024


# ---------------------------------------------------------------------------
# Kernel 1: fused node projection, row-tiled, six lane-aligned outputs.
# ---------------------------------------------------------------------------
def _proj_kernel(x_ref, w_ref, *out_refs):
    y = jnp.dot(x_ref[...], w_ref[...], preferred_element_type=jnp.float32)
    for g, o_ref in enumerate(out_refs):
        start = g * GROUP_W                       # lane-aligned group start
        o_ref[...] = y[:, start:start + o_ref.shape[1]]


def fused_projection(x2d, weights, tile_m=1024):
    """x2d: (M, F) f32.  weights: list of (F, w_g) f32 (scales already folded)."""
    m, f = x2d.shape
    cols = []
    for w in weights:
        pad = GROUP_W - w.shape[1]
        cols.append(jnp.pad(w, ((0, 0), (0, pad))) if pad else w)
    wbig = jnp.concatenate(cols, axis=1).astype(jnp.bfloat16)      # (F, 6*384)
    tm = min(tile_m, m)

    out_shape = [jax.ShapeDtypeStruct((m, w.shape[1]), jnp.float32) for w in weights]
    out_specs = [pl.BlockSpec((tm, w.shape[1]), lambda i: (i, 0)) for w in weights]
    return pl.pallas_call(
        _proj_kernel,
        grid=(pl.cdiv(m, tm),),
        in_specs=[pl.BlockSpec((tm, f), lambda i: (i, 0)),
                  pl.BlockSpec((f, wbig.shape[1]), lambda i: (0, 0))],   # weight resident
        out_specs=out_specs,
        out_shape=out_shape,
        compiler_params=pltpu.CompilerParams(
            dimension_semantics=("parallel",),
            vmem_limit_bytes=VMEM_LIMIT),
    )(x2d.astype(jnp.bfloat16), wbig)


# ---------------------------------------------------------------------------
# Kernel 2: geometric-attention core, one (batch, head) tile per grid step.
#   logits = [q | sqrt2*qs] @ [k | sqrt2*ks]^T   (bf16 MXU, f32 accumulate)
#          + (-||qs_i||^2 + (m_i-1)*INF)         (f32 row bias)
#          + (-||ks_j||^2 + (m_j-1)*INF)         (f32 col bias)
#          + sum_c Wpair[h,c] * z[c]             (in-kernel pair bias, SMEM scalars)
#   exact softmax over keys, alpha *= mask_row, then
#   agg = alpha @ [v | vp]                       (fused node+point aggregation, MXU)
#   p2n[:, c] = sum_j alpha * z[c]               (lane-dense multiply + lane reduce)
#   out = [agg(56) | p2n(16) | zeros(56)]        (one unmasked 128-wide store)
# z / mask have head-constant index maps -> fetched once per batch element.
# ---------------------------------------------------------------------------
def _ga_attention_kernel(wp_ref, qm_ref, km_ref, vc_ref, qb_ref, kb_ref,
                         z_ref, mrow_ref, out_ref):
    h = pl.program_id(1)
    nc = z_ref.shape[1]

    logits = jax.lax.dot_general(
        qm_ref[0, 0], km_ref[0, 0], (((1,), (1,)), ((), ())),
        preferred_element_type=jnp.float32)
    logits = logits + qb_ref[0, 0] + kb_ref[0, 0]
    for c in range(nc):                                   # pair bias, C FMAs over (L, L)
        logits = logits + wp_ref[h, c] * z_ref[0, c].astype(jnp.float32)

    lmax = jnp.max(logits, axis=-1, keepdims=True)
    ex = jnp.exp(logits - lmax)
    denom = jnp.sum(ex, axis=-1, keepdims=True)
    alpha = (ex / denom) * mrow_ref[0]                    # exact softmax, masked rows -> 0

    agg = jnp.dot(alpha.astype(jnp.bfloat16), vc_ref[0, 0],
                  preferred_element_type=jnp.float32)     # (L, V + 3*VP)

    cols = [jnp.sum(alpha * z_ref[0, c].astype(jnp.float32), axis=-1, keepdims=True)
            for c in range(nc)]
    p2n = jnp.concatenate(cols, axis=-1)                  # (L, C)

    lsz = agg.shape[0]
    pad_w = out_ref.shape[-1] - agg.shape[-1] - nc
    out_ref[0, 0] = jnp.concatenate(
        [agg, p2n, jnp.zeros((lsz, pad_w), jnp.float32)], axis=-1)


def ga_attention(wp, qm, km, vc, qb, kb, z_t, mrow):
    n, h, l, _ = qm.shape
    c = z_t.shape[1]
    map_head = lambda b, hh: (b, hh, 0, 0)
    map_z = lambda b, hh: (b, 0, 0, 0)
    map_m = lambda b, hh: (b, 0, 0)

    in_specs = [
        pl.BlockSpec(memory_space=pltpu.MemorySpace.SMEM),        # Wpair (H, C) scalars
        pl.BlockSpec((1, 1, l, QK_CAT), map_head),                # [q | sqrt2*qs]   bf16
        pl.BlockSpec((1, 1, l, QK_CAT), map_head),                # [k | sqrt2*ks]   bf16
        pl.BlockSpec((1, 1, l, VAL_CAT), map_head),               # [v | vp]         bf16
        pl.BlockSpec((1, 1, l, 1), map_head),                     # row bias         f32
        pl.BlockSpec((1, 1, 1, l), map_head),                     # col bias         f32
        pl.BlockSpec((1, c, l, l), map_z),                        # z, resident across heads
        pl.BlockSpec((1, l, 1), map_m),                           # row mask
    ]
    return pl.pallas_call(
        _ga_attention_kernel,
        grid=(n, h),
        in_specs=in_specs,
        out_specs=pl.BlockSpec((1, 1, l, ATTN_OUT_W), map_head),
        out_shape=jax.ShapeDtypeStruct((n, h, l, ATTN_OUT_W), jnp.float32),
        compiler_params=pltpu.CompilerParams(
            dimension_semantics=("parallel", "parallel"),
            vmem_limit_bytes=VMEM_LIMIT),
    )(wp, qm, km, vc, qb, kb, z_t, mrow)


# ---------------------------------------------------------------------------
# Kernel 3: out_transform + mask_zero + residual + LN1 + MLP transition + LN2,
# tiled over (batch, sequence), weights resident, bf16 MXU / f32 LN math.
# ---------------------------------------------------------------------------
def _ga_output_kernel(feat_ref, x_ref, m_ref,
                      wout_ref, bout_ref, g1_ref, be1_ref,
                      w1_ref, b1_ref, w2_ref, b2_ref, w3_ref, b3_ref,
                      g2_ref, be2_ref, o_ref):
    feat = feat_ref[0]        # (tl, Din) f32
    x = x_ref[0]              # (tl, F)   f32
    m = m_ref[0]              # (tl, 1)   f32

    def layer_norm(v, g, b):
        mu = jnp.mean(v, axis=-1, keepdims=True)
        d = v - mu
        var = jnp.mean(d * d, axis=-1, keepdims=True)
        return d * jax.lax.rsqrt(var + LN_EPS) * g + b

    y = jnp.dot(feat.astype(jnp.bfloat16), wout_ref[...],
                preferred_element_type=jnp.float32) + bout_ref[...]
    y = y * m                                             # mask_zero
    h1 = layer_norm(x + y, g1_ref[...], be1_ref[...])

    t = jnp.dot(h1.astype(jnp.bfloat16), w1_ref[...],
                preferred_element_type=jnp.float32) + b1_ref[...]
    t = jnp.maximum(t, 0.0)
    t = jnp.dot(t.astype(jnp.bfloat16), w2_ref[...],
                preferred_element_type=jnp.float32) + b2_ref[...]
    t = jnp.maximum(t, 0.0)
    t = jnp.dot(t.astype(jnp.bfloat16), w3_ref[...],
                preferred_element_type=jnp.float32) + b3_ref[...]

    o_ref[0] = layer_norm(h1 + t, g2_ref[...], be2_ref[...])


def ga_output(feat, x, mrow, params):
    n, l, f = x.shape
    din = feat.shape[-1]
    tl = l if l <= 256 else 256
    map_a = lambda b, i: (b, i, 0)
    map_w = lambda b, i: (0, 0)
    bf = jnp.bfloat16

    in_specs = [
        pl.BlockSpec((1, tl, din), map_a),
        pl.BlockSpec((1, tl, f), map_a),
        pl.BlockSpec((1, tl, 1), map_a),
        pl.BlockSpec((din, f), map_w),   # Wout (bf16)
        pl.BlockSpec((1, f), map_w),     # bout
        pl.BlockSpec((1, f), map_w),     # ln1 gamma
        pl.BlockSpec((1, f), map_w),     # ln1 beta
        pl.BlockSpec((f, f), map_w),     # mlp W1 (bf16)
        pl.BlockSpec((1, f), map_w),
        pl.BlockSpec((f, f), map_w),     # mlp W2 (bf16)
        pl.BlockSpec((1, f), map_w),
        pl.BlockSpec((f, f), map_w),     # mlp W3 (bf16)
        pl.BlockSpec((1, f), map_w),
        pl.BlockSpec((1, f), map_w),     # ln2 gamma
        pl.BlockSpec((1, f), map_w),     # ln2 beta
    ]
    return pl.pallas_call(
        _ga_output_kernel,
        grid=(n, pl.cdiv(l, tl)),
        in_specs=in_specs,
        out_specs=pl.BlockSpec((1, tl, f), map_a),
        out_shape=jax.ShapeDtypeStruct((n, l, f), jnp.float32),
        compiler_params=pltpu.CompilerParams(
            dimension_semantics=("parallel", "parallel"),
            vmem_limit_bytes=VMEM_LIMIT),
    )(feat, x, mrow,
      params['Wout'].astype(bf), params['bout'], params['ln1_g'], params['ln1_b'],
      params['W1'].astype(bf), params['b1'], params['W2'].astype(bf), params['b2'],
      params['W3'].astype(bf), params['b3'], params['ln2_g'], params['ln2_b'])


# ---------------------------------------------------------------------------
# Glue: rigid-frame transforms on 3-vectors (lane dim 3 -> keep in plain JAX)
# ---------------------------------------------------------------------------
def local_to_global(R, t, p):        # p: (N, L, K, 3)
    return jnp.einsum('nlij,nlkj->nlki', R, p) + t[:, :, None, :]


def global_to_local(R, t, q):        # q: (N, L, K, 3)
    return jnp.einsum('nlji,nlkj->nlki', R, q - t[:, :, None, :])


# ---------------------------------------------------------------------------
# Full GABlock forward
# ---------------------------------------------------------------------------
def ga_block_forward(params, R, t, x, z, mask):
    N, L, F = x.shape
    inv3 = np.sqrt(1.0 / 3.0)
    sqrt2 = np.sqrt(2.0)

    # ---- fused node projections (logit scale folded into Wq), one Pallas matmul ----
    Wq_s = params['Wq'] * (inv3 / np.sqrt(D))
    q2, k2, v2, qp2, kp2, vp2 = fused_projection(
        x.reshape(N * L, F),
        [Wq_s, params['Wk'], params['Wv'],
         params['Wqp'], params['Wkp'], params['Wvp']])

    q = q2.reshape(N, L, H, D)                       # already * inv3 / sqrt(D)
    k = k2.reshape(N, L, H, D)
    # NOTE: reference splits proj_value with query_key_dim; equal to value_dim here.
    v = v2.reshape(N, L, H, V)
    qp_l = qp2.reshape(N, L, H * QP, 3)
    kp_l = kp2.reshape(N, L, H * QP, 3)
    vp_l = vp2.reshape(N, L, H * VP, 3)

    # rigid-frame transforms (plain JAX glue)
    qp_g = local_to_global(R, t, qp_l).reshape(N, L, H, QP * 3)
    kp_g = local_to_global(R, t, kp_l).reshape(N, L, H, QP * 3)
    vp_g = local_to_global(R, t, vp_l).reshape(N, L, H, VP * 3)

    # fold per-head spatial coefficient AND the sqrt(1/3) into the points:
    #   spatial logits = 2 qs_i.ks_j - ||qs_i||^2 - ||ks_j||^2
    #   with qs = qp_g * sqrt(softplus(gamma) * sqrt(2/(9 QP)) / 2 * sqrt(1/3))
    gamma = jax.nn.softplus(params['spatial_coef'])                 # (H,)
    pt_scale = jnp.sqrt(gamma * (np.sqrt(2.0 / (9.0 * QP)) / 2.0) * inv3)
    qs = qp_g * pt_scale[None, None, :, None]
    ks = kp_g * pt_scale[None, None, :, None]
    rq = jnp.sum(qs * qs, axis=-1, keepdims=True)                   # (N,L,H,1)
    rk = jnp.sum(ks * ks, axis=-1, keepdims=True)

    # additive mask bias folded into the f32 row/col norm biases
    maskf = mask.astype(jnp.float32)
    mbias = ((maskf - 1.0) * INF)[:, :, None, None]                 # (N,L,1,1)
    qb = jnp.transpose(-rq + mbias, (0, 2, 1, 3))                   # (N,H,L,1)
    kb = jnp.transpose(-rk + mbias, (0, 2, 3, 1))                   # (N,H,1,L)

    bf = jnp.bfloat16
    qm = jnp.transpose(jnp.concatenate([q, sqrt2 * qs], -1), (0, 2, 1, 3)).astype(bf)
    km = jnp.transpose(jnp.concatenate([k, sqrt2 * ks], -1), (0, 2, 1, 3)).astype(bf)
    vc = jnp.transpose(jnp.concatenate([v, vp_g], -1), (0, 2, 1, 3)).astype(bf)

    z_t = jnp.transpose(z, (0, 3, 1, 2)).astype(bf)                 # (N,C,L,L) lane-dense
    mrow = maskf[:, :, None]                                        # (N,L,1)
    wp = jnp.transpose(params['Wpair'] * inv3)                      # (H,C) -> SMEM scalars

    packed = ga_attention(wp, qm, km, vc, qb, kb, z_t, mrow)        # (N,H,L,128)

    node = packed[..., :V]                                          # (N,H,L,32)
    aggr = packed[..., V:V + 3 * VP]                                # (N,H,L,24)
    p2n = packed[..., V + 3 * VP:V + 3 * VP + C]                    # (N,H,L,16)

    feat_node = jnp.transpose(node, (0, 2, 1, 3)).reshape(N, L, H * V)
    feat_p2n = jnp.transpose(p2n, (0, 2, 1, 3)).reshape(N, L, H * C)
    aggr_g = jnp.transpose(aggr, (0, 2, 1, 3)).reshape(N, L, H * VP, 3)

    feat_points = global_to_local(R, t, aggr_g)                     # (N,L,H*VP,3)
    dist = jnp.linalg.norm(feat_points, axis=-1)
    direction = feat_points / (dist[..., None] + 1e-4)
    feat_spatial = jnp.concatenate([
        feat_points.reshape(N, L, -1),
        dist.reshape(N, L, -1),
        direction.reshape(N, L, -1)], axis=-1)                      # (N,L,H*VP*7)

    feat_all = jnp.concatenate([feat_p2n, feat_node, feat_spatial], axis=-1)
    return ga_output(feat_all, x, mrow, params)


# ---------------------------------------------------------------------------
# Deterministic synthetic parameters
# ---------------------------------------------------------------------------
def init_params(key):
    F = NODE_FEAT_DIM
    Din = H * C + H * V + H * VP * (3 + 3 + 1)
    keys = jax.random.split(key, 15)

    def w(k, fi, fo):
        return jax.random.normal(k, (fi, fo), jnp.float32) / np.sqrt(fi)

    def b(k, fo):
        return 0.01 * jax.random.normal(k, (1, fo), jnp.float32)

    return {
        'Wq': w(keys[0], F, H * D),
        'Wk': w(keys[1], F, H * D),
        'Wv': w(keys[2], F, H * V),
        'Wpair': w(keys[3], C, H),
        'Wqp': w(keys[4], F, H * QP * 3),
        'Wkp': w(keys[5], F, H * QP * 3),
        'Wvp': w(keys[6], F, H * VP * 3),
        'spatial_coef': jnp.full((H,), np.log(np.exp(1.0) - 1.0), jnp.float32),
        'Wout': w(keys[7], Din, F),
        'bout': b(keys[8], F),
        'ln1_g': jnp.ones((1, F), jnp.float32),
        'ln1_b': jnp.zeros((1, F), jnp.float32),
        'W1': w(keys[9], F, F), 'b1': b(keys[10], F),
        'W2': w(keys[11], F, F), 'b2': b(keys[12], F),
        'W3': w(keys[13], F, F), 'b3': b(keys[14], F),
        'ln2_g': jnp.ones((1, F), jnp.float32),
        'ln2_b': jnp.zeros((1, F), jnp.float32),
    }


if __name__ == "__main__":
    N, L = 2, 8
    key = jax.random.PRNGKey(0)
    kp, kR, kt, kx, kz = jax.random.split(key, 5)

    params = init_params(kp)

    A = jax.random.normal(kR, (N, L, 3, 3), jnp.float32)
    R_frames, _ = jnp.linalg.qr(A)                       # orthonormal frame bases
    t = jax.random.normal(kt, (N, L, 3), jnp.float32)
    x = jax.random.normal(kx, (N, L, NODE_FEAT_DIM), jnp.float32)
    z = jax.random.normal(kz, (N, L, L, PAIR_FEAT_DIM), jnp.float32)
    mask = jnp.array([[True] * L, [True] * (L - 2) + [False] * 2])

    fwd = jax.jit(ga_block_forward)
    out = jax.block_until_ready(fwd(params, R_frames, t, x, z, mask))

    assert out.shape == (N, L, NODE_FEAT_DIM)
    assert bool(jnp.all(jnp.isfinite(out)))
    print("KERNEL_OK")
</pallas_src>

<mosaic_0001>
module attributes {stable_mosaic.version = 11 : i64} {
  func.func @_proj_kernel(%arg0: i32, %arg1: memref<16x32xbf16, #tpu.memory_space<vmem>>, %arg2: memref<32x2304xbf16, #tpu.memory_space<vmem>>, %arg3: memref<16x384xf32, #tpu.memory_space<vmem>>, %arg4: memref<16x384xf32, #tpu.memory_space<vmem>>, %arg5: memref<16x384xf32, #tpu.memory_space<vmem>>, %arg6: memref<16x288xf32, #tpu.memory_space<vmem>>, %arg7: memref<16x288xf32, #tpu.memory_space<vmem>>, %arg8: memref<16x288xf32, #tpu.memory_space<vmem>>) attributes {dimension_semantics = [#tpu.dimension_semantics<parallel>], iteration_bounds = array<i64: 1>, scalar_prefetch = 0 : i64, scratch_operands = 0 : i64, tpu.core_type = #tpu.core_type<tc>, window_params = [{transform_indices = @transform_0, window_bounds = array<i64: 16, 32>}, {pipeline_mode = #tpu.pipeline_mode<synchronous>, transform_indices = @transform_1, window_bounds = array<i64: 32, 2304>}, {transform_indices = @transform_2, window_bounds = array<i64: 16, 384>}, {transform_indices = @transform_3, window_bounds = array<i64: 16, 384>}, {transform_indices = @transform_4, window_bounds = array<i64: 16, 384>}, {transform_indices = @transform_5, window_bounds = array<i64: 16, 288>}, {transform_indices = @transform_6, window_bounds = array<i64: 16, 288>}, {transform_indices = @transform_7, window_bounds = array<i64: 16, 288>}]} {
    %c0 = arith.constant 0 : index
    %c0_0 = arith.constant 0 : index
    %0 = vector.load %arg1[%c0, %c0_0] : memref<16x32xbf16, #tpu.memory_space<vmem>>, vector<16x32xbf16>
    %c0_1 = arith.constant 0 : index
    %c0_2 = arith.constant 0 : index
    %1 = vector.load %arg2[%c0_1, %c0_2] : memref<32x2304xbf16, #tpu.memory_space<vmem>>, vector<32x2304xbf16>
    %cst = arith.constant dense<0.000000e+00> : vector<16x2304xf32>
    %2 = tpu.matmul %0, %1, %cst {dimension_numbers = #tpu.dot_dimension_numbers<[1], [0], [0], [1], [0, 0, 1, 1], [], []>} : vector<16x32xbf16>, vector<32x2304xbf16>, vector<16x2304xf32> -> vector<16x2304xf32>
    %3 = vector.extract_strided_slice %2 {offsets = [0, 0], sizes = [16, 384], strides = [1, 1]} : vector<16x2304xf32> to vector<16x384xf32>
    %c0_3 = arith.constant 0 : index
    %c0_4 = arith.constant 0 : index
    %4 = vector.load %arg3[%c0_3, %c0_4] : memref<16x384xf32, #tpu.memory_space<vmem>>, vector<16x384xf32>
    tpu.vector_store %arg3[%c0_3, %c0_4], %3 {strides = array<i32>} : memref<16x384xf32, #tpu.memory_space<vmem>>, vector<16x384xf32>,
    %5 = vector.extract_strided_slice %2 {offsets = [0, 384], sizes = [16, 384], strides = [1, 1]} : vector<16x2304xf32> to vector<16x384xf32>
    %c0_5 = arith.constant 0 : index
    %c0_6 = arith.constant 0 : index
    %6 = vector.load %arg4[%c0_5, %c0_6] : memref<16x384xf32, #tpu.memory_space<vmem>>, vector<16x384xf32>
    tpu.vector_store %arg4[%c0_5, %c0_6], %5 {strides = array<i32>} : memref<16x384xf32, #tpu.memory_space<vmem>>, vector<16x384xf32>,
    %7 = vector.extract_strided_slice %2 {offsets = [0, 768], sizes = [16, 384], strides = [1, 1]} : vector<16x2304xf32> to vector<16x384xf32>
    %c0_7 = arith.constant 0 : index
    %c0_8 = arith.constant 0 : index
    %8 = vector.load %arg5[%c0_7, %c0_8] : memref<16x384xf32, #tpu.memory_space<vmem>>, vector<16x384xf32>
    tpu.vector_store %arg5[%c0_7, %c0_8], %7 {strides = array<i32>} : memref<16x384xf32, #tpu.memory_space<vmem>>, vector<16x384xf32>,
    %9 = vector.extract_strided_slice %2 {offsets = [0, 1152], sizes = [16, 288], strides = [1, 1]} : vector<16x2304xf32> to vector<16x288xf32>
    %c0_9 = arith.constant 0 : index
    %c0_10 = arith.constant 0 : index
    %10 = vector.load %arg6[%c0_9, %c0_10] : memref<16x288xf32, #tpu.memory_space<vmem>>, vector<16x288xf32>
    tpu.vector_store %arg6[%c0_9, %c0_10], %9 {strides = array<i32>} : memref<16x288xf32, #tpu.memory_space<vmem>>, vector<16x288xf32>,
    %11 = vector.extract_strided_slice %2 {offsets = [0, 1536], sizes = [16, 288], strides = [1, 1]} : vector<16x2304xf32> to vector<16x288xf32>
    %c0_11 = arith.constant 0 : index
    %c0_12 = arith.constant 0 : index
    %12 = vector.load %arg7[%c0_11, %c0_12] : memref<16x288xf32, #tpu.memory_space<vmem>>, vector<16x288xf32>
    tpu.vector_store %arg7[%c0_11, %c0_12], %11 {strides = array<i32>} : memref<16x288xf32, #tpu.memory_space<vmem>>, vector<16x288xf32>,
    %13 = vector.extract_strided_slice %2 {offsets = [0, 1920], sizes = [16, 288], strides = [1, 1]} : vector<16x2304xf32> to vector<16x288xf32>
    %c0_13 = arith.constant 0 : index
    %c0_14 = arith.constant 0 : index
    %14 = vector.load %arg8[%c0_13, %c0_14] : memref<16x288xf32, #tpu.memory_space<vmem>>, vector<16x288xf32>
    tpu.vector_store %arg8[%c0_13, %c0_14], %13 {strides = array<i32>} : memref<16x288xf32, #tpu.memory_space<vmem>>, vector<16x288xf32>,
    return
  }
  func.func @transform_0(%arg0: i32) -> (i32, i32) {
    %c0_i32 = arith.constant 0 : i32
    %c0_i32_0 = arith.constant 0 : i32
    return %arg0, %c0_i32 : i32, i32
  }
  func.func @transform_1(%arg0: i32) -> (i32, i32) {
    %c0_i32 = arith.constant 0 : i32
    %c0_i32_0 = arith.constant 0 : i32
    %c0_i32_1 = arith.constant 0 : i32
    return %c0_i32, %c0_i32_0 : i32, i32
  }
  func.func @transform_2(%arg0: i32) -> (i32, i32) {
    %c0_i32 = arith.constant 0 : i32
    %c0_i32_0 = arith.constant 0 : i32
    return %arg0, %c0_i32 : i32, i32
  }
  func.func @transform_3(%arg0: i32) -> (i32, i32) {
    %c0_i32 = arith.constant 0 : i32
    %c0_i32_0 = arith.constant 0 : i32
    return %arg0, %c0_i32 : i32, i32
  }
  func.func @transform_4(%arg0: i32) -> (i32, i32) {
    %c0_i32 = arith.constant 0 : i32
    %c0_i32_0 = arith.constant 0 : i32
    return %arg0, %c0_i32 : i32, i32
  }
  func.func @transform_5(%arg0: i32) -> (i32, i32) {
    %c0_i32 = arith.constant 0 : i32
    %c0_i32_0 = arith.constant 0 : i32
    return %arg0, %c0_i32 : i32, i32
  }
  func.func @transform_6(%arg0: i32) -> (i32, i32) {
    %c0_i32 = arith.constant 0 : i32
    %c0_i32_0 = arith.constant 0 : i32
    return %arg0, %c0_i32 : i32, i32
  }
  func.func @transform_7(%arg0: i32) -> (i32, i32) {
    %c0_i32 = arith.constant 0 : i32
    %c0_i32_0 = arith.constant 0 : i32
    return %arg0, %c0_i32 : i32, i32
  }
}

module attributes {stable_mosaic.version = 11 : i64} {
  func.func @_ga_attention_kernel(%arg0: i32, %arg1: i32, %arg2: memref<12x16xf32, #tpu.memory_space<smem>>, %arg3: memref<1x1x8x56xbf16, #tpu.memory_space<vmem>>, %arg4: memref<1x1x8x56xbf16, #tpu.memory_space<vmem>>, %arg5: memref<1x1x8x56xbf16, #tpu.memory_space<vmem>>, %arg6: memref<1x1x8x1xf32, #tpu.memory_space<vmem>>, %arg7: memref<1x1x1x8xf32, #tpu.memory_space<vmem>>, %arg8: memref<1x16x8x8xbf16, #tpu.memory_space<vmem>>, %arg9: memref<1x8x1xf32, #tpu.memory_space<vmem>>, %arg10: memref<1x1x8x128xf32, #tpu.memory_space<vmem>>) attributes {dimension_semantics = [#tpu.dimension_semantics<parallel>, #tpu.dimension_semantics<parallel>], iteration_bounds = array<i64: 2, 12>, scalar_prefetch = 0 : i64, scratch_operands = 0 : i64, tpu.core_type = #tpu.core_type<tc>, window_params = [{transform_indices = @transform_0, window_bounds = array<i64: 12, 16>}, {transform_indices = @transform_1, window_bounds = array<i64: 1, 1, 8, 56>}, {transform_indices = @transform_2, window_bounds = array<i64: 1, 1, 8, 56>}, {transform_indices = @transform_3, window_bounds = array<i64: 1, 1, 8, 56>}, {transform_indices = @transform_4, window_bounds = array<i64: 1, 1, 8, 1>}, {transform_indices = @transform_5, window_bounds = array<i64: 1, 1, 1, 8>}, {transform_indices = @transform_6, window_bounds = array<i64: 1, 16, 8, 8>}, {transform_indices = @transform_7, window_bounds = array<i64: 1, 8, 1>}, {transform_indices = @transform_8, window_bounds = array<i64: 1, 1, 8, 128>}]} {
    %c0 = arith.constant 0 : index
    %c0_0 = arith.constant 0 : index
    %c0_1 = arith.constant 0 : index
    %c0_2 = arith.constant 0 : index
    %0 = vector.load %arg3[%c0, %c0_0, %c0_1, %c0_2] : memref<1x1x8x56xbf16, #tpu.memory_space<vmem>>, vector<1x1x8x56xbf16>
    %1 = vector.shape_cast %0 : vector<1x1x8x56xbf16> to vector<8x56xbf16>
    %c0_3 = arith.constant 0 : index
    %c0_4 = arith.constant 0 : index
    %c0_5 = arith.constant 0 : index
    %c0_6 = arith.constant 0 : index
    %2 = vector.load %arg4[%c0_3, %c0_4, %c0_5, %c0_6] : memref<1x1x8x56xbf16, #tpu.memory_space<vmem>>, vector<1x1x8x56xbf16>
    %3 = vector.shape_cast %2 : vector<1x1x8x56xbf16> to vector<8x56xbf16>
    %cst = arith.constant dense<0.000000e+00> : vector<8x8xf32>
    %4 = tpu.matmul %1, %3, %cst {dimension_numbers = #tpu.dot_dimension_numbers<[1], [1], [0], [0], [0, 0, 1, 0], [], []>} : vector<8x56xbf16>, vector<8x56xbf16>, vector<8x8xf32> -> vector<8x8xf32>
    %c0_7 = arith.constant 0 : index
    %c0_8 = arith.constant 0 : index
    %c0_9 = arith.constant 0 : index
    %c0_10 = arith.constant 0 : index
    %5 = vector.load %arg6[%c0_7, %c0_8, %c0_9, %c0_10] : memref<1x1x8x1xf32, #tpu.memory_space<vmem>>, vector<1x1x8x1xf32>
    %6 = vector.shape_cast %5 : vector<1x1x8x1xf32> to vector<8x1xf32>
    %7 = vector.broadcast %6 : vector<8x1xf32> to vector<8x8xf32>
    %8 = arith.addf %4, %7 : vector<8x8xf32>
    %c0_11 = arith.constant 0 : index
    %c0_12 = arith.constant 0 : index
    %c0_13 = arith.constant 0 : index
    %c0_14 = arith.constant 0 : index
    %9 = vector.load %arg7[%c0_11, %c0_12, %c0_13, %c0_14] : memref<1x1x1x8xf32, #tpu.memory_space<vmem>>, vector<1x1x1x8xf32>
    %10 = vector.shape_cast %9 : vector<1x1x1x8xf32> to vector<1x8xf32>
    %11 = vector.broadcast %10 : vector<1x8xf32> to vector<8x8xf32>
    %12 = arith.addf %8, %11 : vector<8x8xf32>
    %13 = arith.index_cast %arg1 : i32 to index
    %c0_15 = arith.constant 0 : index
    %14 = memref.load %arg2[%13, %c0_15] : memref<12x16xf32, #tpu.memory_space<smem>>
    %c0_16 = arith.constant 0 : index
    %c0_17 = arith.constant 0 : index
    %c0_18 = arith.constant 0 : index
    %c0_19 = arith.constant 0 : index
    %15 = vector.load %arg8[%c0_16, %c0_17, %c0_18, %c0_19] : memref<1x16x8x8xbf16, #tpu.memory_space<vmem>>, vector<1x1x8x8xbf16>
    %16 = vector.shape_cast %15 : vector<1x1x8x8xbf16> to vector<8x8xbf16>
    %17 = arith.extf %16 : vector<8x8xbf16> to vector<8x8xf32>
    %18 = vector.broadcast %14 : f32 to vector<8x8xf32>
    %19 = arith.mulf %18, %17 : vector<8x8xf32>
    %20 = arith.addf %12, %19 : vector<8x8xf32>
    %21 = arith.index_cast %arg1 : i32 to index
    %c1 = arith.constant 1 : index
    %22 = memref.load %arg2[%21, %c1] : memref<12x16xf32, #tpu.memory_space<smem>>
    %c0_20 = arith.constant 0 : index
    %c1_21 = arith.constant 1 : index
    %c0_22 = arith.constant 0 : index
    %c0_23 = arith.constant 0 : index
    %23 = vector.load %arg8[%c0_20, %c1_21, %c0_22, %c0_23] : memref<1x16x8x8xbf16, #tpu.memory_space<vmem>>, vector<1x1x8x8xbf16>
    %24 = vector.shape_cast %23 : vector<1x1x8x8xbf16> to vector<8x8xbf16>
    %25 = arith.extf %24 : vector<8x8xbf16> to vector<8x8xf32>
    %26 = vector.broadcast %22 : f32 to vector<8x8xf32>
    %27 = arith.mulf %26, %25 : vector<8x8xf32>
    %28 = arith.addf %20, %27 : vector<8x8xf32>
    %29 = arith.index_cast %arg1 : i32 to index
    %c2 = arith.constant 2 : index
    %30 = memref.load %arg2[%29, %c2] : memref<12x16xf32, #tpu.memory_space<smem>>
    %c0_24 = arith.constant 0 : index
    %c2_25 = arith.constant 2 : index
    %c0_26 = arith.constant 0 : index
    %c0_27 = arith.constant 0 : index
    %31 = vector.load %arg8[%c0_24, %c2_25, %c0_26, %c0_27] : memref<1x16x8x8xbf16, #tpu.memory_space<vmem>>, vector<1x1x8x8xbf16>
    %32 = vector.shape_cast %31 : vector<1x1x8x8xbf16> to vector<8x8xbf16>
    %33 = arith.extf %32 : vector<8x8xbf16> to vector<8x8xf32>
    %34 = vector.broadcast %30 : f32 to vector<8x8xf32>
    %35 = arith.mulf %34, %33 : vector<8x8xf32>
    %36 = arith.addf %28, %35 : vector<8x8xf32>
    %37 = arith.index_cast %arg1 : i32 to index
    %c3 = arith.constant 3 : index
    %38 = memref.load %arg2[%37, %c3] : memref<12x16xf32, #tpu.memory_space<smem>>
    %c0_28 = arith.constant 0 : index
    %c3_29 = arith.constant 3 : index
    %c0_30 = arith.constant 0 : index
    %c0_31 = arith.constant 0 : index
    %39 = vector.load %arg8[%c0_28, %c3_29, %c0_30, %c0_31] : memref<1x16x8x8xbf16, #tpu.memory_space<vmem>>, vector<1x1x8x8xbf16>
    %40 = vector.shape_cast %39 : vector<1x1x8x8xbf16> to vector<8x8xbf16>
    %41 = arith.extf %40 : vector<8x8xbf16> to vector<8x8xf32>
    %42 = vector.broadcast %38 : f32 to vector<8x8xf32>
    %43 = arith.mulf %42, %41 : vector<8x8xf32>
    %44 = arith.addf %36, %43 : vector<8x8xf32>
    %45 = arith.index_cast %arg1 : i32 to index
    %c4 = arith.constant 4 : index
    %46 = memref.load %arg2[%45, %c4] : memref<12x16xf32, #tpu.memory_space<smem>>
    %c0_32 = arith.constant 0 : index
    %c4_33 = arith.constant 4 : index
    %c0_34 = arith.constant 0 : index
    %c0_35 = arith.constant 0 : index
    %47 = vector.load %arg8[%c0_32, %c4_33, %c0_34, %c0_35] : memref<1x16x8x8xbf16, #tpu.memory_space<vmem>>, vector<1x1x8x8xbf16>
    %48 = vector.shape_cast %47 : vector<1x1x8x8xbf16> to vector<8x8xbf16>
    %49 = arith.extf %48 : vector<8x8xbf16> to vector<8x8xf32>
    %50 = vector.broadcast %46 : f32 to vector<8x8xf32>
    %51 = arith.mulf %50, %49 : vector<8x8xf32>
    %52 = arith.addf %44, %51 : vector<8x8xf32>
    %53 = arith.index_cast %arg1 : i32 to index
    %c5 = arith.constant 5 : index
    %54 = memref.load %arg2[%53, %c5] : memref<12x16xf32, #tpu.memory_space<smem>>
    %c0_36 = arith.constant 0 : index
    %c5_37 = arith.constant 5 : index
    %c0_38 = arith.constant 0 : index
    %c0_39 = arith.constant 0 : index
    %55 = vector.load %arg8[%c0_36, %c5_37, %c0_38, %c0_39] : memref<1x16x8x8xbf16, #tpu.memory_space<vmem>>, vector<1x1x8x8xbf16>
    %56 = vector.shape_cast %55 : vector<1x1x8x8xbf16> to vector<8x8xbf16>
    %57 = arith.extf %56 : vector<8x8xbf16> to vector<8x8xf32>
    %58 = vector.broadcast %54 : f32 to vector<8x8xf32>
    %59 = arith.mulf %58, %57 : vector<8x8xf32>
    %60 = arith.addf %52, %59 : vector<8x8xf32>
    %61 = arith.index_cast %arg1 : i32 to index
    %c6 = arith.constant 6 : index
    %62 = memref.load %arg2[%61, %c6] : memref<12x16xf32, #tpu.memory_space<smem>>
    %c0_40 = arith.constant 0 : index
    %c6_41 = arith.constant 6 : index
    %c0_42 = arith.constant 0 : index
    %c0_43 = arith.constant 0 : index
    %63 = vector.load %arg8[%c0_40, %c6_41, %c0_42, %c0_43] : memref<1x16x8x8xbf16, #tpu.memory_space<vmem>>, vector<1x1x8x8xbf16>
    %64 = vector.shape_cast %63 : vector<1x1x8x8xbf16> to vector<8x8xbf16>
    %65 = arith.extf %64 : vector<8x8xbf16> to vector<8x8xf32>
    %66 = vector.broadcast %62 : f32 to vector<8x8xf32>
    %67 = arith.mulf %66, %65 : vector<8x8xf32>
    %68 = arith.addf %60, %67 : vector<8x8xf32>
    %69 = arith.index_cast %arg1 : i32 to index
    %c7 = arith.constant 7 : index
    %70 = memref.load %arg2[%69, %c7] : memref<12x16xf32, #tpu.memory_space<smem>>
    %c0_44 = arith.constant 0 : index
    %c7_45 = arith.constant 7 : index
    %c0_46 = arith.constant 0 : index
    %c0_47 = arith.constant 0 : index
    %71 = vector.load %arg8[%c0_44, %c7_45, %c0_46, %c0_47] : memref<1x16x8x8xbf16, #tpu.memory_space<vmem>>, vector<1x1x8x8xbf16>
    %72 = vector.shape_cast %71 : vector<1x1x8x8xbf16> to vector<8x8xbf16>
    %73 = arith.extf %72 : vector<8x8xbf16> to vector<8x8xf32>
    %74 = vector.broadcast %70 : f32 to vector<8x8xf32>
    %75 = arith.mulf %74, %73 : vector<8x8xf32>
    %76 = arith.addf %68, %75 : vector<8x8xf32>
    %77 = arith.index_cast %arg1 : i32 to index
    %c8 = arith.constant 8 : index
    %78 = memref.load %arg2[%77, %c8] : memref<12x16xf32, #tpu.memory_space<smem>>
    %c0_48 = arith.constant 0 : index
    %c8_49 = arith.constant 8 : index
    %c0_50 = arith.constant 0 : index
    %c0_51 = arith.constant 0 : index
    %79 = vector.load %arg8[%c0_48, %c8_49, %c0_50, %c0_51] : memref<1x16x8x8xbf16, #tpu.memory_space<vmem>>, vector<1x1x8x8xbf16>
    %80 = vector.shape_cast %79 : vector<1x1x8x8xbf16> to vector<8x8xbf16>
    %81 = arith.extf %80 : vector<8x8xbf16> to vector<8x8xf32>
    %82 = vector.broadcast %78 : f32 to vector<8x8xf32>
    %83 = arith.mulf %82, %81 : vector<8x8xf32>
    %84 = arith.addf %76, %83 : vector<8x8xf32>
    %85 = arith.index_cast %arg1 : i32 to index
    %c9 = arith.constant 9 : index
    %86 = memref.load %arg2[%85, %c9] : memref<12x16xf32, #tpu.memory_space<smem>>
    %c0_52 = arith.constant 0 : index
    %c9_53 = arith.constant 9 : index
    %c0_54 = arith.constant 0 : index
    %c0_55 = arith.constant 0 : index
    %87 = vector.load %arg8[%c0_52, %c9_53, %c0_54, %c0_55] : memref<1x16x8x8xbf16, #tpu.memory_space<vmem>>, vector<1x1x8x8xbf16>
    %88 = vector.shape_cast %87 : vector<1x1x8x8xbf16> to vector<8x8xbf16>
    %89 = arith.extf %88 : vector<8x8xbf16> to vector<8x8xf32>
    %90 = vector.broadcast %86 : f32 to vector<8x8xf32>
    %91 = arith.mulf %90, %89 : vector<8x8xf32>
    %92 = arith.addf %84, %91 : vector<8x8xf32>
    %93 = arith.index_cast %arg1 : i32 to index
    %c10 = arith.constant 10 : index
    %94 = memref.load %arg2[%93, %c10] : memref<12x16xf32, #tpu.memory_space<smem>>
    %c0_56 = arith.constant 0 : index
    %c10_57 = arith.constant 10 : index
    %c0_58 = arith.constant 0 : index
    %c0_59 = arith.constant 0 : index
    %95 = vector.load %arg8[%c0_56, %c10_57, %c0_58, %c0_59] : memref<1x16x8x8xbf16, #tpu.memory_space<vmem>>, vector<1x1x8x8xbf16>
    %96 = vector.shape_cast %95 : vector<1x1x8x8xbf16> to vector<8x8xbf16>
    %97 = arith.extf %96 : vector<8x8xbf16> to vector<8x8xf32>
    %98 = vector.broadcast %94 : f32 to vector<8x8xf32>
    %99 = arith.mulf %98, %97 : vector<8x8xf32>
    %100 = arith.addf %92, %99 : vector<8x8xf32>
    %101 = arith.index_cast %arg1 : i32 to index
    %c11 = arith.constant 11 : index
    %102 = memref.load %arg2[%101, %c11] : memref<12x16xf32, #tpu.memory_space<smem>>
    %c0_60 = arith.constant 0 : index
    %c11_61 = arith.constant 11 : index
    %c0_62 = arith.constant 0 : index
    %c0_63 = arith.constant 0 : index
    %103 = vector.load %arg8[%c0_60, %c11_61, %c0_62, %c0_63] : memref<1x16x8x8xbf16, #tpu.memory_space<vmem>>, vector<1x1x8x8xbf16>
    %104 = vector.shape_cast %103 : vector<1x1x8x8xbf16> to vector<8x8xbf16>
    %105 = arith.extf %104 : vector<8x8xbf16> to vector<8x8xf32>
    %106 = vector.broadcast %102 : f32 to vector<8x8xf32>
    %107 = arith.mulf %106, %105 : vector<8x8xf32>
    %108 = arith.addf %100, %107 : vector<8x8xf32>
    %109 = arith.index_cast %arg1 : i32 to index
    %c12 = arith.constant 12 : index
    %110 = memref.load %arg2[%109, %c12] : memref<12x16xf32, #tpu.memory_space<smem>>
    %c0_64 = arith.constant 0 : index
    %c12_65 = arith.constant 12 : index
    %c0_66 = arith.constant 0 : index
    %c0_67 = arith.constant 0 : index
    %111 = vector.load %arg8[%c0_64, %c12_65, %c0_66, %c0_67] : memref<1x16x8x8xbf16, #tpu.memory_space<vmem>>, vector<1x1x8x8xbf16>
    %112 = vector.shape_cast %111 : vector<1x1x8x8xbf16> to vector<8x8xbf16>
    %113 = arith.extf %112 : vector<8x8xbf16> to vector<8x8xf32>
    %114 = vector.broadcast %110 : f32 to vector<8x8xf32>
    %115 = arith.mulf %114, %113 : vector<8x8xf32>
    %116 = arith.addf %108, %115 : vector<8x8xf32>
    %117 = arith.index_cast %arg1 : i32 to index
    %c13 = arith.constant 13 : index
    %118 = memref.load %arg2[%117, %c13] : memref<12x16xf32, #tpu.memory_space<smem>>
    %c0_68 = arith.constant 0 : index
    %c13_69 = arith.constant 13 : index
    %c0_70 = arith.constant 0 : index
    %c0_71 = arith.constant 0 : index
    %119 = vector.load %arg8[%c0_68, %c13_69, %c0_70, %c0_71] : memref<1x16x8x8xbf16, #tpu.memory_space<vmem>>, vector<1x1x8x8xbf16>
    %120 = vector.shape_cast %119 : vector<1x1x8x8xbf16> to vector<8x8xbf16>
    %121 = arith.extf %120 : vector<8x8xbf16> to vector<8x8xf32>
    %122 = vector.broadcast %118 : f32 to vector<8x8xf32>
    %123 = arith.mulf %122, %121 : vector<8x8xf32>
    %124 = arith.addf %116, %123 : vector<8x8xf32>
    %125 = arith.index_cast %arg1 : i32 to index
    %c14 = arith.constant 14 : index
    %126 = memref.load %arg2[%125, %c14] : memref<12x16xf32, #tpu.memory_space<smem>>
    %c0_72 = arith.constant 0 : index
    %c14_73 = arith.constant 14 : index
    %c0_74 = arith.constant 0 : index
    %c0_75 = arith.constant 0 : index
    %127 = vector.load %arg8[%c0_72, %c14_73, %c0_74, %c0_75] : memref<1x16x8x8xbf16, #tpu.memory_space<vmem>>, vector<1x1x8x8xbf16>
    %128 = vector.shape_cast %127 : vector<1x1x8x8xbf16> to vector<8x8xbf16>
    %129 = arith.extf %128 : vector<8x8xbf16> to vector<8x8xf32>
    %130 = vector.broadcast %126 : f32 to vector<8x8xf32>
    %131 = arith.mulf %130, %129 : vector<8x8xf32>
    %132 = arith.addf %124, %131 : vector<8x8xf32>
    %133 = arith.index_cast %arg1 : i32 to index
    %c15 = arith.constant 15 : index
    %134 = memref.load %arg2[%133, %c15] : memref<12x16xf32, #tpu.memory_space<smem>>
    %c0_76 = arith.constant 0 : index
    %c15_77 = arith.constant 15 : index
    %c0_78 = arith.constant 0 : index
    %c0_79 = arith.constant 0 : index
    %135 = vector.load %arg8[%c0_76, %c15_77, %c0_78, %c0_79] : memref<1x16x8x8xbf16, #tpu.memory_space<vmem>>, vector<1x1x8x8xbf16>
    %136 = vector.shape_cast %135 : vector<1x1x8x8xbf16> to vector<8x8xbf16>
    %137 = arith.extf %136 : vector<8x8xbf16> to vector<8x8xf32>
    %138 = vector.broadcast %134 : f32 to vector<8x8xf32>
    %139 = arith.mulf %138, %137 : vector<8x8xf32>
    %140 = arith.addf %132, %139 : vector<8x8xf32>
    %cst_80 = arith.constant dense<0xFF800000> : vector<8xf32>
    %141 = vector.multi_reduction <maximumf>, %140, %cst_80 [1] : vector<8x8xf32> to vector<8xf32>
    %142 = vector.shape_cast %141 : vector<8xf32> to vector<8x1xf32>
    %143 = vector.broadcast %142 : vector<8x1xf32> to vector<8x8xf32>
    %144 = arith.subf %140, %143 : vector<8x8xf32>
    %145 = math.exp %144 : vector<8x8xf32>
    %cst_81 = arith.constant dense<0.000000e+00> : vector<8xf32>
    %146 = vector.multi_reduction <add>, %145, %cst_81 [1] : vector<8x8xf32> to vector<8xf32>
    %147 = vector.shape_cast %146 : vector<8xf32> to vector<8x1xf32>
    %148 = vector.broadcast %147 : vector<8x1xf32> to vector<8x8xf32>
    %149 = arith.divf %145, %148 : vector<8x8xf32>
    %c0_82 = arith.constant 0 : index
    %c0_83 = arith.constant 0 : index
    %c0_84 = arith.constant 0 : index
    %150 = vector.load %arg9[%c0_82, %c0_83, %c0_84] : memref<1x8x1xf32, #tpu.memory_space<vmem>>, vector<1x8x1xf32>
    %151 = vector.shape_cast %150 : vector<1x8x1xf32> to vector<8x1xf32>
    %152 = vector.broadcast %151 : vector<8x1xf32> to vector<8x8xf32>
    %153 = arith.mulf %149, %152 : vector<8x8xf32>
    %154 = arith.truncf %153 : vector<8x8xf32> to vector<8x8xbf16>
    %c0_85 = arith.constant 0 : index
    %c0_86 = arith.constant 0 : index
    %c0_87 = arith.constant 0 : index
    %c0_88 = arith.constant 0 : index
    %155 = vector.load %arg5[%c0_85, %c0_86, %c0_87, %c0_88] : memref<1x1x8x56xbf16, #tpu.memory_space<vmem>>, vector<1x1x8x56xbf16>
    %156 = vector.shape_cast %155 : vector<1x1x8x56xbf16> to vector<8x56xbf16>
    %cst_89 = arith.constant dense<0.000000e+00> : vector<8x56xf32>
    %157 = tpu.matmul %154, %156, %cst_89 {dimension_numbers = #tpu.dot_dimension_numbers<[1], [0], [0], [1], [0, 0, 1, 1], [], []>} : vector<8x8xbf16>, vector<8x56xbf16>, vector<8x56xf32> -> vector<8x56xf32>
    %c0_90 = arith.constant 0 : index
    %c0_91 = arith.constant 0 : index
    %c0_92 = arith.constant 0 : index
    %c0_93 = arith.constant 0 : index
    %158 = vector.load %arg8[%c0_90, %c0_91, %c0_92, %c0_93] : memref<1x16x8x8xbf16, #tpu.memory_space<vmem>>, vector<1x1x8x8xbf16>
    %159 = vector.shape_cast %158 : vector<1x1x8x8xbf16> to vector<8x8xbf16>
    %160 = arith.extf %159 : vector<8x8xbf16> to vector<8x8xf32>
    %161 = arith.mulf %153, %160 : vector<8x8xf32>
    %cst_94 = arith.constant dense<0.000000e+00> : vector<8xf32>
    %162 = vector.multi_reduction <add>, %161, %cst_94 [1] : vector<8x8xf32> to vector<8xf32>
    %163 = vector.shape_cast %162 : vector<8xf32> to vector<8x1xf32>
    %c0_95 = arith.constant 0 : index
    %c1_96 = arith.constant 1 : index
    %c0_97 = arith.constant 0 : index
    %c0_98 = arith.constant 0 : index
    %164 = vector.load %arg8[%c0_95, %c1_96, %c0_97, %c0_98] : memref<1x16x8x8xbf16, #tpu.memory_space<vmem>>, vector<1x1x8x8xbf16>
    %165 = vector.shape_cast %164 : vector<1x1x8x8xbf16> to vector<8x8xbf16>
    %166 = arith.extf %165 : vector<8x8xbf16> to vector<8x8xf32>
    %167 = arith.mulf %153, %166 : vector<8x8xf32>
    %cst_99 = arith.constant dense<0.000000e+00> : vector<8xf32>
    %168 = vector.multi_reduction <add>, %167, %cst_99 [1] : vector<8x8xf32> to vector<8xf32>
    %169 = vector.shape_cast %168 : vector<8xf32> to vector<8x1xf32>
    %c0_100 = arith.constant 0 : index
    %c2_101 = arith.constant 2 : index
    %c0_102 = arith.constant 0 : index
    %c0_103 = arith.constant 0 : index
    %170 = vector.load %arg8[%c0_100, %c2_101, %c0_102, %c0_103] : memref<1x16x8x8xbf16, #tpu.memory_space<vmem>>, vector<1x1x8x8xbf16>
    %171 = vector.shape_cast %170 : vector<1x1x8x8xbf16> to vector<8x8xbf16>
    %172 = arith.extf %171 : vector<8x8xbf16> to vector<8x8xf32>
    %173 = arith.mulf %153, %172 : vector<8x8xf32>
    %cst_104 = arith.constant dense<0.000000e+00> : vector<8xf32>
    %174 = vector.multi_reduction <add>, %173, %cst_104 [1] : vector<8x8xf32> to vector<8xf32>
    %175 = vector.shape_cast %174 : vector<8xf32> to vector<8x1xf32>
    %c0_105 = arith.constant 0 : index
    %c3_106 = arith.constant 3 : index
    %c0_107 = arith.constant 0 : index
    %c0_108 = arith.constant 0 : index
    %176 = vector.load %arg8[%c0_105, %c3_106, %c0_107, %c0_108] : memref<1x16x8x8xbf16, #tpu.memory_space<vmem>>, vector<1x1x8x8xbf16>
    %177 = vector.shape_cast %176 : vector<1x1x8x8xbf16> to vector<8x8xbf16>
    %178 = arith.extf %177 : vector<8x8xbf16> to vector<8x8xf32>
    %179 = arith.mulf %153, %178 : vector<8x8xf32>
    %cst_109 = arith.constant dense<0.000000e+00> : vector<8xf32>
    %180 = vector.multi_reduction <add>, %179, %cst_109 [1] : vector<8x8xf32> to vector<8xf32>
    %181 = vector.shape_cast %180 : vector<8xf32> to vector<8x1xf32>
    %c0_110 = arith.constant 0 : index
    %c4_111 = arith.constant 4 : index
    %c0_112 = arith.constant 0 : index
    %c0_113 = arith.constant 0 : index
    %182 = vector.load %arg8[%c0_110, %c4_111, %c0_112, %c0_113] : memref<1x16x8x8xbf16, #tpu.memory_space<vmem>>, vector<1x1x8x8xbf16>
    %183 = vector.shape_cast %182 : vector<1x1x8x8xbf16> to vector<8x8xbf16>
    %184 = arith.extf %183 : vector<8x8xbf16> to vector<8x8xf32>
    %185 = arith.mulf %153, %184 : vector<8x8xf32>
    %cst_114 = arith.constant dense<0.000000e+00> : vector<8xf32>
    %186 = vector.multi_reduction <add>, %185, %cst_114 [1] : vector<8x8xf32> to vector<8xf32>
    %187 = vector.shape_cast %186 : vector<8xf32> to vector<8x1xf32>
    %c0_115 = arith.constant 0 : index
    %c5_116 = arith.constant 5 : index
    %c0_117 = arith.constant 0 : index
    %c0_118 = arith.constant 0 : index
    %188 = vector.load %arg8[%c0_115, %c5_116, %c0_117, %c0_118] : memref<1x16x8x8xbf16, #tpu.memory_space<vmem>>, vector<1x1x8x8xbf16>
    %189 = vector.shape_cast %188 : vector<1x1x8x8xbf16> to vector<8x8xbf16>
    %190 = arith.extf %189 : vector<8x8xbf16> to vector<8x8xf32>
    %191 = arith.mulf %153, %190 : vector<8x8xf32>
    %cst_119 = arith.constant dense<0.000000e+00> : vector<8xf32>
    %192 = vector.multi_reduction <add>, %191, %cst_119 [1] : vector<8x8xf32> to vector<8xf32>
    %193 = vector.shape_cast %192 : vector<8xf32> to vector<8x1xf32>
    %c0_120 = arith.constant 0 : index
    %c6_121 = arith.constant 6 : index
    %c0_122 = arith.constant 0 : index
    %c0_123 = arith.constant 0 : index
    %194 = vector.load %arg8[%c0_120, %c6_121, %c0_122, %c0_123] : memref<1x16x8x8xbf16, #tpu.memory_space<vmem>>, vector<1x1x8x8xbf16>
    %195 = vector.shape_cast %194 : vector<1x1x8x8xbf16> to vector<8x8xbf16>
    %196 = arith.extf %195 : vector<8x8xbf16> to vector<8x8xf32>
    %197 = arith.mulf %153, %196 : vector<8x8xf32>
    %cst_124 = arith.constant dense<0.000000e+00> : vector<8xf32>
    %198 = vector.multi_reduction <add>, %197, %cst_124 [1] : vector<8x8xf32> to vector<8xf32>
    %199 = vector.shape_cast %198 : vector<8xf32> to vector<8x1xf32>
    %c0_125 = arith.constant 0 : index
    %c7_126 = arith.constant 7 : index
    %c0_127 = arith.constant 0 : index
    %c0_128 = arith.constant 0 : index
    %200 = vector.load %arg8[%c0_125, %c7_126, %c0_127, %c0_128] : memref<1x16x8x8xbf16, #tpu.memory_space<vmem>>, vector<1x1x8x8xbf16>
    %201 = vector.shape_cast %200 : vector<1x1x8x8xbf16> to vector<8x8xbf16>
    %202 = arith.extf %201 : vector<8x8xbf16> to vector<8x8xf32>
    %203 = arith.mulf %153, %202 : vector<8x8xf32>
    %cst_129 = arith.constant dense<0.000000e+00> : vector<8xf32>
    %204 = vector.multi_reduction <add>, %203, %cst_129 [1] : vector<8x8xf32> to vector<8xf32>
    %205 = vector.shape_cast %204 : vector<8xf32> to vector<8x1xf32>
    %c0_130 = arith.constant 0 : index
    %c8_131 = arith.constant 8 : index
    %c0_132 = arith.constant 0 : index
    %c0_133 = arith.constant 0 : index
    %206 = vector.load %arg8[%c0_130, %c8_131, %c0_132, %c0_133] : memref<1x16x8x8xbf16, #tpu.memory_space<vmem>>, vector<1x1x8x8xbf16>
    %207 = vector.shape_cast %206 : vector<1x1x8x8xbf16> to vector<8x8xbf16>
    %208 = arith.extf %207 : vector<8x8xbf16> to vector<8x8xf32>
    %209 = arith.mulf %153, %208 : vector<8x8xf32>
    %cst_134 = arith.constant dense<0.000000e+00> : vector<8xf32>
    %210 = vector.multi_reduction <add>, %209, %cst_134 [1] : vector<8x8xf32> to vector<8xf32>
    %211 = vector.shape_cast %210 : vector<8xf32> to vector<8x1xf32>
    %c0_135 = arith.constant 0 : index
    %c9_136 = arith.constant 9 : index
    %c0_137 = arith.constant 0 : index
    %c0_138 = arith.constant 0 : index
    %212 = vector.load %arg8[%c0_135, %c9_136, %c0_137, %c0_138] : memref<1x16x8x8xbf16, #tpu.memory_space<vmem>>, vector<1x1x8x8xbf16>
    %213 = vector.shape_cast %212 : vector<1x1x8x8xbf16> to vector<8x8xbf16>
    %214 = arith.extf %213 : vector<8x8xbf16> to vector<8x8xf32>
    %215 = arith.mulf %153, %214 : vector<8x8xf32>
    %cst_139 = arith.constant dense<0.000000e+00> : vector<8xf32>
    %216 = vector.multi_reduction <add>, %215, %cst_139 [1] : vector<8x8xf32> to vector<8xf32>
    %217 = vector.shape_cast %216 : vector<8xf32> to vector<8x1xf32>
    %c0_140 = arith.constant 0 : index
    %c10_141 = arith.constant 10 : index
    %c0_142 = arith.constant 0 : index
    %c0_143 = arith.constant 0 : index
    %218 = vector.load %arg8[%c0_140, %c10_141, %c0_142, %c0_143] : memref<1x16x8x8xbf16, #tpu.memory_space<vmem>>, vector<1x1x8x8xbf16>
    %219 = vector.shape_cast %218 : vector<1x1x8x8xbf16> to vector<8x8xbf16>
    %220 = arith.extf %219 : vector<8x8xbf16> to vector<8x8xf32>
    %221 = arith.mulf %153, %220 : vector<8x8xf32>
    %cst_144 = arith.constant dense<0.000000e+00> : vector<8xf32>
    %222 = vector.multi_reduction <add>, %221, %cst_144 [1] : vector<8x8xf32> to vector<8xf32>
    %223 = vector.shape_cast %222 : vector<8xf32> to vector<8x1xf32>
    %c0_145 = arith.constant 0 : index
    %c11_146 = arith.constant 11 : index
    %c0_147 = arith.constant 0 : index
    %c0_148 = arith.constant 0 : index
    %224 = vector.load %arg8[%c0_145, %c11_146, %c0_147, %c0_148] : memref<1x16x8x8xbf16, #tpu.memory_space<vmem>>, vector<1x1x8x8xbf16>
    %225 = vector.shape_cast %224 : vector<1x1x8x8xbf16> to vector<8x8xbf16>
    %226 = arith.extf %225 : vector<8x8xbf16> to vector<8x8xf32>
    %227 = arith.mulf %153, %226 : vector<8x8xf32>
    %cst_149 = arith.constant dense<0.000000e+00> : vector<8xf32>
    %228 = vector.multi_reduction <add>, %227, %cst_149 [1] : vector<8x8xf32> to vector<8xf32>
    %229 = vector.shape_cast %228 : vector<8xf32> to vector<8x1xf32>
    %c0_150 = arith.constant 0 : index
    %c12_151 = arith.constant 12 : index
    %c0_152 = arith.constant 0 : index
    %c0_153 = arith.constant 0 : index
    %230 = vector.load %arg8[%c0_150, %c12_151, %c0_152, %c0_153] : memref<1x16x8x8xbf16, #tpu.memory_space<vmem>>, vector<1x1x8x8xbf16>
    %231 = vector.shape_cast %230 : vector<1x1x8x8xbf16> to vector<8x8xbf16>
    %232 = arith.extf %231 : vector<8x8xbf16> to vector<8x8xf32>
    %233 = arith.mulf %153, %232 : vector<8x8xf32>
    %cst_154 = arith.constant dense<0.000000e+00> : vector<8xf32>
    %234 = vector.multi_reduction <add>, %233, %cst_154 [1] : vector<8x8xf32> to vector<8xf32>
    %235 = vector.shape_cast %234 : vector<8xf32> to vector<8x1xf32>
    %c0_155 = arith.constant 0 : index
    %c13_156 = arith.constant 13 : index
    %c0_157 = arith.constant 0 : index
    %c0_158 = arith.constant 0 : index
    %236 = vector.load %arg8[%c0_155, %c13_156, %c0_157, %c0_158] : memref<1x16x8x8xbf16, #tpu.memory_space<vmem>>, vector<1x1x8x8xbf16>
    %237 = vector.shape_cast %236 : vector<1x1x8x8xbf16> to vector<8x8xbf16>
    %238 = arith.extf %237 : vector<8x8xbf16> to vector<8x8xf32>
    %239 = arith.mulf %153, %238 : vector<8x8xf32>
    %cst_159 = arith.constant dense<0.000000e+00> : vector<8xf32>
    %240 = vector.multi_reduction <add>, %239, %cst_159 [1] : vector<8x8xf32> to vector<8xf32>
    %241 = vector.shape_cast %240 : vector<8xf32> to vector<8x1xf32>
    %c0_160 = arith.constant 0 : index
    %c14_161 = arith.constant 14 : index
    %c0_162 = arith.constant 0 : index
    %c0_163 = arith.constant 0 : index
    %242 = vector.load %arg8[%c0_160, %c14_161, %c0_162, %c0_163] : memref<1x16x8x8xbf16, #tpu.memory_space<vmem>>, vector<1x1x8x8xbf16>
    %243 = vector.shape_cast %242 : vector<1x1x8x8xbf16> to vector<8x8xbf16>
    %244 = arith.extf %243 : vector<8x8xbf16> to vector<8x8xf32>
    %245 = arith.mulf %153, %244 : vector<8x8xf32>
    %cst_164 = arith.constant dense<0.000000e+00> : vector<8xf32>
    %246 = vector.multi_reduction <add>, %245, %cst_164 [1] : vector<8x8xf32> to vector<8xf32>
    %247 = vector.shape_cast %246 : vector<8xf32> to vector<8x1xf32>
    %c0_165 = arith.constant 0 : index
    %c15_166 = arith.constant 15 : index
    %c0_167 = arith.constant 0 : index
    %c0_168 = arith.constant 0 : index
    %248 = vector.load %arg8[%c0_165, %c15_166, %c0_167, %c0_168] : memref<1x16x8x8xbf16, #tpu.memory_space<vmem>>, vector<1x1x8x8xbf16>
    %249 = vector.shape_cast %248 : vector<1x1x8x8xbf16> to vector<8x8xbf16>
    %250 = arith.extf %249 : vector<8x8xbf16> to vector<8x8xf32>
    %251 = arith.mulf %153, %250 : vector<8x8xf32>
    %cst_169 = arith.constant dense<0.000000e+00> : vector<8xf32>
    %252 = vector.multi_reduction <add>, %251, %cst_169 [1] : vector<8x8xf32> to vector<8xf32>
    %253 = vector.shape_cast %252 : vector<8xf32> to vector<8x1xf32>
    %254 = tpu.concatenate %163, %169, %175, %181, %187, %193, %199, %205, %211, %217, %223, %229, %235, %241, %247, %253 in 1 : vector<8x1xf32>, vector<8x1xf32>, vector<8x1xf32>, vector<8x1xf32>, vector<8x1xf32>, vector<8x1xf32>, vector<8x1xf32>, vector<8x1xf32>, vector<8x1xf32>, vector<8x1xf32>, vector<8x1xf32>, vector<8x1xf32>, vector<8x1xf32>, vector<8x1xf32>, vector<8x1xf32>, vector<8x1xf32> -> vector<8x16xf32>
    %cst_170 = arith.constant 0.000000e+00 : f32
    %255 = vector.broadcast %cst_170 : f32 to vector<8x56xf32>
    %256 = tpu.concatenate %157, %254, %255 in 1 : vector<8x56xf32>, vector<8x16xf32>, vector<8x56xf32> -> vector<8x128xf32>
    %c0_171 = arith.constant 0 : index
    %c0_172 = arith.constant 0 : index
    %c0_173 = arith.constant 0 : index
    %c0_174 = arith.constant 0 : index
    %257 = vector.load %arg10[%c0_171, %c0_172, %c0_173, %c0_174] : memref<1x1x8x128xf32, #tpu.memory_space<vmem>>, vector<1x1x8x128xf32>
    %258 = vector.shape_cast %257 : vector<1x1x8x128xf32> to vector<8x128xf32>
    %259 = vector.shape_cast %256 : vector<8x128xf32> to vector<1x1x8x128xf32>
    tpu.vector_store %arg10[%c0_171, %c0_172, %c0_173, %c0_174], %259 {strides = array<i32>} : memref<1x1x8x128xf32, #tpu.memory_space<vmem>>, vector<1x1x8x128xf32>,
    return
  }
  func.func @transform_0(%arg0: i32, %arg1: i32) -> (i32, i32) {
    %c0_i32 = arith.constant 0 : i32
    %c0_i32_0 = arith.constant 0 : i32
    %c0_i32_1 = arith.constant 0 : i32
    return %c0_i32, %c0_i32_0 : i32, i32
  }
  func.func @transform_1(%arg0: i32, %arg1: i32) -> (i32, i32, i32, i32) {
    %c0_i32 = arith.constant 0 : i32
    %c0_i32_0 = arith.constant 0 : i32
    %c0_i32_1 = arith.constant 0 : i32
    return %arg0, %arg1, %c0_i32, %c0_i32_0 : i32, i32, i32, i32
  }
  func.func @transform_2(%arg0: i32, %arg1: i32) -> (i32, i32, i32, i32) {
    %c0_i32 = arith.constant 0 : i32
    %c0_i32_0 = arith.constant 0 : i32
    %c0_i32_1 = arith.constant 0 : i32
    return %arg0, %arg1, %c0_i32, %c0_i32_0 : i32, i32, i32, i32
  }
  func.func @transform_3(%arg0: i32, %arg1: i32) -> (i32, i32, i32, i32) {
    %c0_i32 = arith.constant 0 : i32
    %c0_i32_0 = arith.constant 0 : i32
    %c0_i32_1 = arith.constant 0 : i32
    return %arg0, %arg1, %c0_i32, %c0_i32_0 : i32, i32, i32, i32
  }
  func.func @transform_4(%arg0: i32, %arg1: i32) -> (i32, i32, i32, i32) {
    %c0_i32 = arith.constant 0 : i32
    %c0_i32_0 = arith.constant 0 : i32
    %c0_i32_1 = arith.constant 0 : i32
    return %arg0, %arg1, %c0_i32, %c0_i32_0 : i32, i32, i32, i32
  }
  func.func @transform_5(%arg0: i32, %arg1: i32) -> (i32, i32, i32, i32) {
    %c0_i32 = arith.constant 0 : i32
    %c0_i32_0 = arith.constant 0 : i32
    %c0_i32_1 = arith.constant 0 : i32
    return %arg0, %arg1, %c0_i32, %c0_i32_0 : i32, i32, i32, i32
  }
  func.func @transform_6(%arg0: i32, %arg1: i32) -> (i32, i32, i32, i32) {
    %c0_i32 = arith.constant 0 : i32
    %c0_i32_0 = arith.constant 0 : i32
    %c0_i32_1 = arith.constant 0 : i32
    %c0_i32_2 = arith.constant 0 : i32
    return %arg0, %c0_i32, %c0_i32_0, %c0_i32_1 : i32, i32, i32, i32
  }
  func.func @transform_7(%arg0: i32, %arg1: i32) -> (i32, i32, i32) {
    %c0_i32 = arith.constant 0 : i32
    %c0_i32_0 = arith.constant 0 : i32
    %c0_i32_1 = arith.constant 0 : i32
    return %arg0, %c0_i32, %c0_i32_0 : i32, i32, i32
  }
  func.func @transform_8(%arg0: i32, %arg1: i32) -> (i32, i32, i32, i32) {
    %c0_i32 = arith.constant 0 : i32
    %c0_i32_0 = arith.constant 0 : i32
    %c0_i32_1 = arith.constant 0 : i32
    return %arg0, %arg1, %c0_i32, %c0_i32_0 : i32, i32, i32, i32
  }
}

module attributes {stable_mosaic.version = 11 : i64} {
  func.func @_ga_output_kernel(%arg0: i32, %arg1: i32, %arg2: memref<1x8x1248xf32, #tpu.memory_space<vmem>>, %arg3: memref<1x8x32xf32, #tpu.memory_space<vmem>>, %arg4: memref<1x8x1xf32, #tpu.memory_space<vmem>>, %arg5: memref<1248x32xbf16, #tpu.memory_space<vmem>>, %arg6: memref<1x32xf32, #tpu.memory_space<vmem>>, %arg7: memref<1x32xf32, #tpu.memory_space<vmem>>, %arg8: memref<1x32xf32, #tpu.memory_space<vmem>>, %arg9: memref<32x32xbf16, #tpu.memory_space<vmem>>, %arg10: memref<1x32xf32, #tpu.memory_space<vmem>>, %arg11: memref<32x32xbf16, #tpu.memory_space<vmem>>, %arg12: memref<1x32xf32, #tpu.memory_space<vmem>>, %arg13: memref<32x32xbf16, #tpu.memory_space<vmem>>, %arg14: memref<1x32xf32, #tpu.memory_space<vmem>>, %arg15: memref<1x32xf32, #tpu.memory_space<vmem>>, %arg16: memref<1x32xf32, #tpu.memory_space<vmem>>, %arg17: memref<1x8x32xf32, #tpu.memory_space<vmem>>) attributes {dimension_semantics = [#tpu.dimension_semantics<parallel>, #tpu.dimension_semantics<parallel>], iteration_bounds = array<i64: 2, 1>, scalar_prefetch = 0 : i64, scratch_operands = 0 : i64, tpu.core_type = #tpu.core_type<tc>, window_params = [{transform_indices = @transform_0, window_bounds = array<i64: 1, 8, 1248>}, {transform_indices = @transform_1, window_bounds = array<i64: 1, 8, 32>}, {transform_indices = @transform_2, window_bounds = array<i64: 1, 8, 1>}, {pipeline_mode = #tpu.pipeline_mode<synchronous>, transform_indices = @transform_3, window_bounds = array<i64: 1248, 32>}, {pipeline_mode = #tpu.pipeline_mode<synchronous>, transform_indices = @transform_4, window_bounds = array<i64: 1, 32>}, {pipeline_mode = #tpu.pipeline_mode<synchronous>, transform_indices = @transform_5, window_bounds = array<i64: 1, 32>}, {pipeline_mode = #tpu.pipeline_mode<synchronous>, transform_indices = @transform_6, window_bounds = array<i64: 1, 32>}, {pipeline_mode = #tpu.pipeline_mode<synchronous>, transform_indices = @transform_7, window_bounds = array<i64: 32, 32>}, {pipeline_mode = #tpu.pipeline_mode<synchronous>, transform_indices = @transform_8, window_bounds = array<i64: 1, 32>}, {pipeline_mode = #tpu.pipeline_mode<synchronous>, transform_indices = @transform_9, window_bounds = array<i64: 32, 32>}, {pipeline_mode = #tpu.pipeline_mode<synchronous>, transform_indices = @transform_10, window_bounds = array<i64: 1, 32>}, {pipeline_mode = #tpu.pipeline_mode<synchronous>, transform_indices = @transform_11, window_bounds = array<i64: 32, 32>}, {pipeline_mode = #tpu.pipeline_mode<synchronous>, transform_indices = @transform_12, window_bounds = array<i64: 1, 32>}, {pipeline_mode = #tpu.pipeline_mode<synchronous>, transform_indices = @transform_13, window_bounds = array<i64: 1, 32>}, {pipeline_mode = #tpu.pipeline_mode<synchronous>, transform_indices = @transform_14, window_bounds = array<i64: 1, 32>}, {transform_indices = @transform_15, window_bounds = array<i64: 1, 8, 32>}]} {
    %c0 = arith.constant 0 : index
    %c0_0 = arith.constant 0 : index
    %c0_1 = arith.constant 0 : index
    %0 = vector.load %arg2[%c0, %c0_0, %c0_1] : memref<1x8x1248xf32, #tpu.memory_space<vmem>>, vector<1x8x1248xf32>
    %1 = vector.shape_cast %0 : vector<1x8x1248xf32> to vector<8x1248xf32>
    %c0_2 = arith.constant 0 : index
    %c0_3 = arith.constant 0 : index
    %c0_4 = arith.constant 0 : index
    %2 = vector.load %arg3[%c0_2, %c0_3, %c0_4] : memref<1x8x32xf32, #tpu.memory_space<vmem>>, vector<1x8x32xf32>
    %3 = vector.shape_cast %2 : vector<1x8x32xf32> to vector<8x32xf32>
    %c0_5 = arith.constant 0 : index
    %c0_6 = arith.constant 0 : index
    %c0_7 = arith.constant 0 : index
    %4 = vector.load %arg4[%c0_5, %c0_6, %c0_7] : memref<1x8x1xf32, #tpu.memory_space<vmem>>, vector<1x8x1xf32>
    %5 = vector.shape_cast %4 : vector<1x8x1xf32> to vector<8x1xf32>
    %6 = arith.truncf %1 : vector<8x1248xf32> to vector<8x1248xbf16>
    %c0_8 = arith.constant 0 : index
    %c0_9 = arith.constant 0 : index
    %7 = vector.load %arg5[%c0_8, %c0_9] : memref<1248x32xbf16, #tpu.memory_space<vmem>>, vector<1248x32xbf16>
    %cst = arith.constant dense<0.000000e+00> : vector<8x32xf32>
    %8 = tpu.matmul %6, %7, %cst {dimension_numbers = #tpu.dot_dimension_numbers<[1], [0], [0], [1], [0, 0, 1, 1], [], []>} : vector<8x1248xbf16>, vector<1248x32xbf16>, vector<8x32xf32> -> vector<8x32xf32>
    %c0_10 = arith.constant 0 : index
    %c0_11 = arith.constant 0 : index
    %9 = vector.load %arg6[%c0_10, %c0_11] : memref<1x32xf32, #tpu.memory_space<vmem>>, vector<1x32xf32>
    %10 = vector.broadcast %9 : vector<1x32xf32> to vector<8x32xf32>
    %11 = arith.addf %8, %10 : vector<8x32xf32>
    %12 = vector.broadcast %5 : vector<8x1xf32> to vector<8x32xf32>
    %13 = arith.mulf %11, %12 : vector<8x32xf32>
    %14 = arith.addf %3, %13 : vector<8x32xf32>
    %c0_12 = arith.constant 0 : index
    %c0_13 = arith.constant 0 : index
    %15 = vector.load %arg7[%c0_12, %c0_13] : memref<1x32xf32, #tpu.memory_space<vmem>>, vector<1x32xf32>
    %c0_14 = arith.constant 0 : index
    %c0_15 = arith.constant 0 : index
    %16 = vector.load %arg8[%c0_14, %c0_15] : memref<1x32xf32, #tpu.memory_space<vmem>>, vector<1x32xf32>
    %cst_16 = arith.constant dense<0.000000e+00> : vector<8xf32>
    %17 = vector.multi_reduction <add>, %14, %cst_16 [1] : vector<8x32xf32> to vector<8xf32>
    %18 = vector.shape_cast %17 : vector<8xf32> to vector<8x1xf32>
    %cst_17 = arith.constant 3.200000e+01 : f32
    %19 = vector.broadcast %cst_17 : f32 to vector<8x1xf32>
    %20 = arith.divf %18, %19 : vector<8x1xf32>
    %21 = vector.broadcast %20 : vector<8x1xf32> to vector<8x32xf32>
    %22 = arith.subf %14, %21 : vector<8x32xf32>
    %23 = arith.mulf %22, %22 : vector<8x32xf32>
    %cst_18 = arith.constant dense<0.000000e+00> : vector<8xf32>
    %24 = vector.multi_reduction <add>, %23, %cst_18 [1] : vector<8x32xf32> to vector<8xf32>
    %25 = vector.shape_cast %24 : vector<8xf32> to vector<8x1xf32>
    %cst_19 = arith.constant 3.200000e+01 : f32
    %26 = vector.broadcast %cst_19 : f32 to vector<8x1xf32>
    %27 = arith.divf %25, %26 : vector<8x1xf32>
    %cst_20 = arith.constant 9.99999974E-6 : f32
    %28 = vector.broadcast %cst_20 : f32 to vector<8x1xf32>
    %29 = arith.addf %27, %28 : vector<8x1xf32>
    %30 = math.rsqrt %29 : vector<8x1xf32>
    %31 = vector.broadcast %30 : vector<8x1xf32> to vector<8x32xf32>
    %32 = arith.mulf %22, %31 : vector<8x32xf32>
    %33 = vector.broadcast %15 : vector<1x32xf32> to vector<8x32xf32>
    %34 = arith.mulf %32, %33 : vector<8x32xf32>
    %35 = vector.broadcast %16 : vector<1x32xf32> to vector<8x32xf32>
    %36 = arith.addf %34, %35 : vector<8x32xf32>
    %37 = arith.truncf %36 : vector<8x32xf32> to vector<8x32xbf16>
    %c0_21 = arith.constant 0 : index
    %c0_22 = arith.constant 0 : index
    %38 = vector.load %arg9[%c0_21, %c0_22] : memref<32x32xbf16, #tpu.memory_space<vmem>>, vector<32x32xbf16>
    %cst_23 = arith.constant dense<0.000000e+00> : vector<8x32xf32>
    %39 = tpu.matmul %37, %38, %cst_23 {dimension_numbers = #tpu.dot_dimension_numbers<[1], [0], [0], [1], [0, 0, 1, 1], [], []>} : vector<8x32xbf16>, vector<32x32xbf16>, vector<8x32xf32> -> vector<8x32xf32>
    %c0_24 = arith.constant 0 : index
    %c0_25 = arith.constant 0 : index
    %40 = vector.load %arg10[%c0_24, %c0_25] : memref<1x32xf32, #tpu.memory_space<vmem>>, vector<1x32xf32>
    %41 = vector.broadcast %40 : vector<1x32xf32> to vector<8x32xf32>
    %42 = arith.addf %39, %41 : vector<8x32xf32>
    %cst_26 = arith.constant 0.000000e+00 : f32
    %43 = vector.broadcast %cst_26 : f32 to vector<8x32xf32>
    %44 = arith.maximumf %42, %43 : vector<8x32xf32>
    %45 = arith.truncf %44 : vector<8x32xf32> to vector<8x32xbf16>
    %c0_27 = arith.constant 0 : index
    %c0_28 = arith.constant 0 : index
    %46 = vector.load %arg11[%c0_27, %c0_28] : memref<32x32xbf16, #tpu.memory_space<vmem>>, vector<32x32xbf16>
    %cst_29 = arith.constant dense<0.000000e+00> : vector<8x32xf32>
    %47 = tpu.matmul %45, %46, %cst_29 {dimension_numbers = #tpu.dot_dimension_numbers<[1], [0], [0], [1], [0, 0, 1, 1], [], []>} : vector<8x32xbf16>, vector<32x32xbf16>, vector<8x32xf32> -> vector<8x32xf32>
    %c0_30 = arith.constant 0 : index
    %c0_31 = arith.constant 0 : index
    %48 = vector.load %arg12[%c0_30, %c0_31] : memref<1x32xf32, #tpu.memory_space<vmem>>, vector<1x32xf32>
    %49 = vector.broadcast %48 : vector<1x32xf32> to vector<8x32xf32>
    %50 = arith.addf %47, %49 : vector<8x32xf32>
    %cst_32 = arith.constant 0.000000e+00 : f32
    %51 = vector.broadcast %cst_32 : f32 to vector<8x32xf32>
    %52 = arith.maximumf %50, %51 : vector<8x32xf32>
    %53 = arith.truncf %52 : vector<8x32xf32> to vector<8x32xbf16>
    %c0_33 = arith.constant 0 : index
    %c0_34 = arith.constant 0 : index
    %54 = vector.load %arg13[%c0_33, %c0_34] : memref<32x32xbf16, #tpu.memory_space<vmem>>, vector<32x32xbf16>
    %cst_35 = arith.constant dense<0.000000e+00> : vector<8x32xf32>
    %55 = tpu.matmul %53, %54, %cst_35 {dimension_numbers = #tpu.dot_dimension_numbers<[1], [0], [0], [1], [0, 0, 1, 1], [], []>} : vector<8x32xbf16>, vector<32x32xbf16>, vector<8x32xf32> -> vector<8x32xf32>
    %c0_36 = arith.constant 0 : index
    %c0_37 = arith.constant 0 : index
    %56 = vector.load %arg14[%c0_36, %c0_37] : memref<1x32xf32, #tpu.memory_space<vmem>>, vector<1x32xf32>
    %57 = vector.broadcast %56 : vector<1x32xf32> to vector<8x32xf32>
    %58 = arith.addf %55, %57 : vector<8x32xf32>
    %59 = arith.addf %36, %58 : vector<8x32xf32>
    %c0_38 = arith.constant 0 : index
    %c0_39 = arith.constant 0 : index
    %60 = vector.load %arg15[%c0_38, %c0_39] : memref<1x32xf32, #tpu.memory_space<vmem>>, vector<1x32xf32>
    %c0_40 = arith.constant 0 : index
    %c0_41 = arith.constant 0 : index
    %61 = vector.load %arg16[%c0_40, %c0_41] : memref<1x32xf32, #tpu.memory_space<vmem>>, vector<1x32xf32>
    %cst_42 = arith.constant dense<0.000000e+00> : vector<8xf32>
    %62 = vector.multi_reduction <add>, %59, %cst_42 [1] : vector<8x32xf32> to vector<8xf32>
    %63 = vector.shape_cast %62 : vector<8xf32> to vector<8x1xf32>
    %cst_43 = arith.constant 3.200000e+01 : f32
    %64 = vector.broadcast %cst_43 : f32 to vector<8x1xf32>
    %65 = arith.divf %63, %64 : vector<8x1xf32>
    %66 = vector.broadcast %65 : vector<8x1xf32> to vector<8x32xf32>
    %67 = arith.subf %59, %66 : vector<8x32xf32>
    %68 = arith.mulf %67, %67 : vector<8x32xf32>
    %cst_44 = arith.constant dense<0.000000e+00> : vector<8xf32>
    %69 = vector.multi_reduction <add>, %68, %cst_44 [1] : vector<8x32xf32> to vector<8xf32>
    %70 = vector.shape_cast %69 : vector<8xf32> to vector<8x1xf32>
    %cst_45 = arith.constant 3.200000e+01 : f32
    %71 = vector.broadcast %cst_45 : f32 to vector<8x1xf32>
    %72 = arith.divf %70, %71 : vector<8x1xf32>
    %cst_46 = arith.constant 9.99999974E-6 : f32
    %73 = vector.broadcast %cst_46 : f32 to vector<8x1xf32>
    %74 = arith.addf %72, %73 : vector<8x1xf32>
    %75 = math.rsqrt %74 : vector<8x1xf32>
    %76 = vector.broadcast %75 : vector<8x1xf32> to vector<8x32xf32>
    %77 = arith.mulf %67, %76 : vector<8x32xf32>
    %78 = vector.broadcast %60 : vector<1x32xf32> to vector<8x32xf32>
    %79 = arith.mulf %77, %78 : vector<8x32xf32>
    %80 = vector.broadcast %61 : vector<1x32xf32> to vector<8x32xf32>
    %81 = arith.addf %79, %80 : vector<8x32xf32>
    %c0_47 = arith.constant 0 : index
    %c0_48 = arith.constant 0 : index
    %c0_49 = arith.constant 0 : index
    %82 = vector.load %arg17[%c0_47, %c0_48, %c0_49] : memref<1x8x32xf32, #tpu.memory_space<vmem>>, vector<1x8x32xf32>
    %83 = vector.shape_cast %82 : vector<1x8x32xf32> to vector<8x32xf32>
    %84 = vector.shape_cast %81 : vector<8x32xf32> to vector<1x8x32xf32>
    tpu.vector_store %arg17[%c0_47, %c0_48, %c0_49], %84 {strides = array<i32>} : memref<1x8x32xf32, #tpu.memory_space<vmem>>, vector<1x8x32xf32>,
    return
  }
  func.func @transform_0(%arg0: i32, %arg1: i32) -> (i32, i32, i32) {
    %c0_i32 = arith.constant 0 : i32
    %c0_i32_0 = arith.constant 0 : i32
    return %arg0, %arg1, %c0_i32 : i32, i32, i32
  }
  func.func @transform_1(%arg0: i32, %arg1: i32) -> (i32, i32, i32) {
    %c0_i32 = arith.constant 0 : i32
    %c0_i32_0 = arith.constant 0 : i32
    return %arg0, %arg1, %c0_i32 : i32, i32, i32
  }
  func.func @transform_2(%arg0: i32, %arg1: i32) -> (i32, i32, i32) {
    %c0_i32 = arith.constant 0 : i32
    %c0_i32_0 = arith.constant 0 : i32
    return %arg0, %arg1, %c0_i32 : i32, i32, i32
  }
  func.func @transform_3(%arg0: i32, %arg1: i32) -> (i32, i32) {
    %c0_i32 = arith.constant 0 : i32
    %c0_i32_0 = arith.constant 0 : i32
    %c0_i32_1 = arith.constant 0 : i32
    return %c0_i32, %c0_i32_0 : i32, i32
  }
  func.func @transform_4(%arg0: i32, %arg1: i32) -> (i32, i32) {
    %c0_i32 = arith.constant 0 : i32
    %c0_i32_0 = arith.constant 0 : i32
    %c0_i32_1 = arith.constant 0 : i32
    return %c0_i32, %c0_i32_0 : i32, i32
  }
  func.func @transform_5(%arg0: i32, %arg1: i32) -> (i32, i32) {
    %c0_i32 = arith.constant 0 : i32
    %c0_i32_0 = arith.constant 0 : i32
    %c0_i32_1 = arith.constant 0 : i32
    return %c0_i32, %c0_i32_0 : i32, i32
  }
  func.func @transform_6(%arg0: i32, %arg1: i32) -> (i32, i32) {
    %c0_i32 = arith.constant 0 : i32
    %c0_i32_0 = arith.constant 0 : i32
    %c0_i32_1 = arith.constant 0 : i32
    return %c0_i32, %c0_i32_0 : i32, i32
  }
  func.func @transform_7(%arg0: i32, %arg1: i32) -> (i32, i32) {
    %c0_i32 = arith.constant 0 : i32
    %c0_i32_0 = arith.constant 0 : i32
    %c0_i32_1 = arith.constant 0 : i32
    return %c0_i32, %c0_i32_0 : i32, i32
  }
  func.func @transform_8(%arg0: i32, %arg1: i32) -> (i32, i32) {
    %c0_i32 = arith.constant 0 : i32
    %c0_i32_0 = arith.constant 0 : i32
    %c0_i32_1 = arith.constant 0 : i32
    return %c0_i32, %c0_i32_0 : i32, i32
  }
  func.func @transform_9(%arg0: i32, %arg1: i32) -> (i32, i32) {
    %c0_i32 = arith.constant 0 : i32
    %c0_i32_0 = arith.constant 0 : i32
    %c0_i32_1 = arith.constant 0 : i32
    return %c0_i32, %c0_i32_0 : i32, i32
  }
  func.func @transform_10(%arg0: i32, %arg1: i32) -> (i32, i32) {
    %c0_i32 = arith.constant 0 : i32
    %c0_i32_0 = arith.constant 0 : i32
    %c0_i32_1 = arith.constant 0 : i32
    return %c0_i32, %c0_i32_0 : i32, i32
  }
  func.func @transform_11(%arg0: i32, %arg1: i32) -> (i32, i32) {
    %c0_i32 = arith.constant 0 : i32
    %c0_i32_0 = arith.constant 0 : i32
    %c0_i32_1 = arith.constant 0 : i32
    return %c0_i32, %c0_i32_0 : i32, i32
  }
  func.func @transform_12(%arg0: i32, %arg1: i32) -> (i32, i32) {
    %c0_i32 = arith.constant 0 : i32
    %c0_i32_0 = arith.constant 0 : i32
    %c0_i32_1 = arith.constant 0 : i32
    return %c0_i32, %c0_i32_0 : i32, i32
  }
  func.func @transform_13(%arg0: i32, %arg1: i32) -> (i32, i32) {
    %c0_i32 = arith.constant 0 : i32
    %c0_i32_0 = arith.constant 0 : i32
    %c0_i32_1 = arith.constant 0 : i32
    return %c0_i32, %c0_i32_0 : i32, i32
  }
  func.func @transform_14(%arg0: i32, %arg1: i32) -> (i32, i32) {
    %c0_i32 = arith.constant 0 : i32
    %c0_i32_0 = arith.constant 0 : i32
    %c0_i32_1 = arith.constant 0 : i32
    return %c0_i32, %c0_i32_0 : i32, i32
  }
  func.func @transform_15(%arg0: i32, %arg1: i32) -> (i32, i32, i32) {
    %c0_i32 = arith.constant 0 : i32
    %c0_i32_0 = arith.constant 0 : i32
    return %arg0, %arg1, %c0_i32 : i32, i32, i32
  }
}

</mosaic_0001>

<bundles_post_ra>
// kernel: ga_block_forward.3
= control target key start
LH: loop header
LB: loop body
LE: loop exit
PB: predicated region body
PF: predicated region fallthrough
CT: control target
= control target key end

     0   :  { %v794_v1 = vmov 0   ;;  %vm241_vm0 = vcmask 261120   ;;  %s1089_s1 = inlined_call_operand.vmem [shape: bf16[32,2304], index: 1, kind: input, shape index: {}]   ;;  %s1090_s0 = inlined_call_operand.vmem [shape: bf16[16,32], index: 0, kind: input, shape index: {}]   ;;  %s1091_s2 = inlined_call_operand.vmem [shape: f32[16,384], index: 2, kind: output, shape index: {0}]   ;;  %s1092_s3 = inlined_call_operand.vmem [shape: f32[16,384], index: 3, kind: output, shape index: {1}]   ;;  %s1093_s4 = inlined_call_operand.vmem [shape: f32[16,384], index: 4, kind: output, shape index: {2}]   ;;  %s1094_s5 = inlined_call_operand.vmem [shape: f32[16,288], index: 5, kind: output, shape index: {3}]   ;;  %s1095_s6 = inlined_call_operand.vmem [shape: f32[16,288], index: 6, kind: output, shape index: {4}]   ;;  %s1096_s7 = inlined_call_operand.vmem [shape: f32[16,288], index: 7, kind: output, shape index: {5}]  }
   0x1   :  { %v739_v0 = vld [vmem:[%s1089_s1 + $0x94] ss:$72 sps:$4 sm:$0xff]   ;;  %277 = vmatprep.mubr.bf16.mxu0 %v794_v1  ;;  %320 = vmatprep.mubr.bf16.mxu1 %v794_v1  ;;  %v741_v2 = vld [vmem:[%s1089_s1 + $0x90] ss:$72 sps:$4 sm:$0xff]   ;;  %v744_v4 = vld [vmem:[%s1089_s1 + $0x4] ss:$72 sps:$4 sm:$0xff]  }
   0x2   :  { %257 = vmatprep.subr.bf16.mxu0 %v739_v0  ;;  %v742_v3 = vld [vmem:[%s1089_s1 + $0x9c] ss:$72 sps:$4 sm:$0xff]   ;;  %v746_v5 = vld [vmem:[%s1089_s1 + $0x98] ss:$72 sps:$4 sm:$0xff]   ;;  %v748_v7 = vld [vmem:[%s1089_s1 + $0xc] ss:$72 sps:$4 sm:$0xff]  }
   0x3   :  { %258 = vmatpush1.bf16.msra.mxu0 %v741_v2  ;;  %v747_v6 = vld [vmem:[%s1089_s1] ss:$72 sps:$4 sm:$0xff]   ;;  %300 = vmatprep.subr.bf16.mxu1 %v742_v3  ;;  %v754_v11 = vld [vmem:[%s1089_s1 + $0xa4] ss:$72 sps:$4 sm:$0xff]   ;;  %v760_v14 = vld [vmem:[%s1089_s1 + $0x14] ss:$72 sps:$4 sm:$0xff]  }
   0x4   :  { %259 = vmatprep.subr.bf16.mxu0 %v744_v4  ;;  %301 = vmatpush1.bf16.msra.mxu1 %v746_v5  ;;  %v861_v8 = vld [vmem:[%s1090_s0] sm:$0xff]   ;;  %v751_v9 = vld [vmem:[%s1089_s1 + $0x8] ss:$72 sps:$4 sm:$0xff]   ;;  %v757_v12 = vld [vmem:[%s1089_s1 + $0xac] ss:$72 sps:$4 sm:$0xff]  }
   0x5   :  { %302 = vmatprep.subr.bf16.mxu1 %v748_v7  ;;  %v752_v10 = vld [vmem:[%s1089_s1 + $0xa0] ss:$72 sps:$4 sm:$0xff]   ;;  %v758_v15 = vld [vmem:[%s1089_s1 + $0x10] ss:$72 sps:$4 sm:$0xff]   ;;  %v763_v16 = vld [vmem:[%s1089_s1 + $0x1c] ss:$72 sps:$4 sm:$0xff]  }
   0x6   :  { %v755_v13 = vld [vmem:[%s1089_s1 + $0xa8] ss:$72 sps:$4 sm:$0xff]   ;;  %v766_v17 = vld [vmem:[%s1089_s1 + $0xb4] ss:$72 sps:$4 sm:$0xff]   ;;  %v761_v18 = vld [vmem:[%s1089_s1 + $0x18] ss:$72 sps:$4 sm:$0xff]  }
   0x7   :  { %260 = vmatpush1.bf16.msra.mxu0 %v747_v6  ;;  %v769_v19 = vld [vmem:[%s1089_s1 + $0xbc] ss:$72 sps:$4 sm:$0xff]   ;;  %v764_v20 = vld [vmem:[%s1089_s1 + $0xb0] ss:$72 sps:$4 sm:$0xff]   ;;  %v775_v23 = vld [vmem:[%s1089_s1 + $0x2c] ss:$72 sps:$4 sm:$0xff]  }
   0x8   :  { %303 = vmatpush1.bf16.msra.mxu1 %v751_v9  ;;  %343 = vmatprep.subr.bf16.mxu0 %v754_v11  ;;  %v772_v21 = vld [vmem:[%s1089_s1 + $0x24] ss:$72 sps:$4 sm:$0xff]   ;;  %v767_v22 = vld [vmem:[%s1089_s1 + $0xb8] ss:$72 sps:$4 sm:$0xff]   ;;  %v773_v26 = vld [vmem:[%s1089_s1 + $0x28] ss:$72 sps:$4 sm:$0xff]  }
   0x9   :  { %386 = vmatprep.subr.bf16.mxu1 %v757_v12  ;;  %v770_v24 = vld [vmem:[%s1089_s1 + $0x20] ss:$72 sps:$4 sm:$0xff]   ;;  %v778_v25 = vld [vmem:[%s1089_s1 + $0xc4] ss:$72 sps:$4 sm:$0xff]   ;;  %v784_v29 = vld [vmem:[%s1089_s1 + $0x34] ss:$72 sps:$4 sm:$0xff]  }
   0xa   :  { %729 = vmatmul.mubr.msk.bf16.vlgmr.msra.gmra.mxu0 %vm241_vm0, %v861_v8  ;;  %v781_v27 = vld [vmem:[%s1089_s1 + $0xcc] ss:$72 sps:$4 sm:$0xff]   ;;  %v776_v28 = vld [vmem:[%s1089_s1 + $0xc0] ss:$72 sps:$4 sm:$0xff]   ;;  %v787_v31 = vld [vmem:[%s1089_s1 + $0x3c] ss:$72 sps:$4 sm:$0xff]  }
   0xb   :  { %344 = vmatpush1.bf16.msra.mxu0 %v752_v10  ;;  %363 = vmatprep.mubr.bf16.mxu0 %v794_v1  ;;  %v779_v30 = vld [vmem:[%s1089_s1 + $0xc8] ss:$72 sps:$4 sm:$0xff]   ;;  %v790_v33 = vld [vmem:[%s1089_s1 + $0xd4] ss:$72 sps:$4 sm:$0xff]   ;;  %v785_v34 = vld [vmem:[%s1089_s1 + $0x38] ss:$72 sps:$4 sm:$0xff]  }
   0xc   :  { %730 = vmatmul.mubr.msk.bf16.vlgmr.msra.gmra.mxu1 %vm241_vm0, %v861_v8  ;;  %345 = vmatprep.subr.bf16.mxu0 %v760_v14  ;;  %v782_v32 = vld [vmem:[%s1089_s1 + $0x30] ss:$72 sps:$4 sm:$0xff]   ;;  %v793_v36 = vld [vmem:[%s1089_s1 + $0x44] ss:$72 sps:$4 sm:$0xff]   ;;  %v791_v37 = vld [vmem:[%s1089_s1 + $0x40] ss:$72 sps:$4 sm:$0xff]  }
   0xd   :  { %387 = vmatpush1.bf16.msra.mxu1 %v755_v13  ;;  %406 = vmatprep.mubr.bf16.mxu1 %v794_v1  ;;  %v788_v35 = vld [vmem:[%s1089_s1 + $0xd0] ss:$72 sps:$4 sm:$0xff]  }
   0xe   :  { %388 = vmatprep.subr.bf16.mxu1 %v763_v16 }
   0xf   :  { %346 = vmatpush1.bf16.msra.mxu0 %v758_v15 }
  0x10   :  { %429 = vmatprep.subr.bf16.mxu0 %v766_v17 }
  0x11   :  { %389 = vmatpush1.bf16.msra.mxu1 %v761_v18 }
  0x12   :  { %731 = vmatmul.mubr.msk.bf16.vlgmr.msra.gmra.mxu0 %vm241_vm0, %v861_v8  ;;  %472 = vmatprep.subr.bf16.mxu1 %v769_v19 }
  0x13   :  { %430 = vmatpush1.bf16.msra.mxu0 %v764_v20  ;;  %449 = vmatprep.mubr.bf16.mxu0 %v794_v1 }
  0x14   :  { %732 = vmatmul.mubr.msk.bf16.vlgmr.msra.gmra.mxu1 %vm241_vm0, %v861_v8  ;;  %431 = vmatprep.subr.bf16.mxu0 %v772_v21 }
  0x15   :  { %473 = vmatpush1.bf16.msra.mxu1 %v767_v22  ;;  %492 = vmatprep.mubr.bf16.mxu1 %v794_v1 }
  0x16   :  { %474 = vmatprep.subr.bf16.mxu1 %v775_v23 }
  0x17   :  { %432 = vmatpush1.bf16.msra.mxu0 %v770_v24 }
  0x18   :  { %515 = vmatprep.subr.bf16.mxu0 %v778_v25 }
  0x19   :  { %475 = vmatpush1.bf16.msra.mxu1 %v773_v26 }
  0x1a   :  { %733 = vmatmul.mubr.msk.bf16.vlgmr.msra.gmra.mxu0 %vm241_vm0, %v861_v8  ;;  %558 = vmatprep.subr.bf16.mxu1 %v781_v27 }
  0x1b   :  { %516 = vmatpush1.bf16.msra.mxu0 %v776_v28  ;;  %535 = vmatprep.mubr.bf16.mxu0 %v794_v1 }
  0x1c   :  { %734 = vmatmul.mubr.msk.bf16.vlgmr.msra.gmra.mxu1 %vm241_vm0, %v861_v8  ;;  %517 = vmatprep.subr.bf16.mxu0 %v784_v29 }
  0x1d   :  { %559 = vmatpush1.bf16.msra.mxu1 %v779_v30  ;;  %578 = vmatprep.mubr.bf16.mxu1 %v794_v1 }
  0x1e   :  { %560 = vmatprep.subr.bf16.mxu1 %v787_v31 }
  0x1f   :  { %518 = vmatpush1.bf16.msra.mxu0 %v782_v32 }
  0x20   :  { %601 = vmatprep.subr.bf16.mxu0 %v790_v33 }
  0x21   :  { %561 = vmatpush1.bf16.msra.mxu1 %v785_v34 }
  0x22   :  { %735 = vmatmul.mubr.msk.bf16.vlgmr.msra.gmra.mxu0 %vm241_vm0, %v861_v8 }
  0x23   :  { %602 = vmatpush1.bf16.msra.mxu0 %v788_v35  ;;  %621 = vmatprep.mubr.bf16.mxu0 %v794_v1 }
  0x24   :  { %736 = vmatmul.mubr.msk.bf16.vlgmr.msra.gmra.mxu1 %vm241_vm0, %v861_v8  ;;  %603 = vmatprep.subr.bf16.mxu0 %v793_v36 }
  0x27   :  { %604 = vmatpush1.bf16.msra.mxu0 %v791_v37 }
  0x2a   :  { %737 = vmatmul.mubr.msk.bf16.vlgmr.msra.gmra.mxu0 %vm241_vm0, %v861_v8 }
  0xca   :  { %v279_v38 = vpop.f32.mrf.mxu0 }
  0xcb   :  { %632 = vst [vmem:[%s1091_s2] sm:$0xff] %v279_v38 }
  0xcc   :  { %v281_v39 = vpop.f32.mrf.mxu0  ;;  %v322_v40 = vpop.f32.mrf.mxu1 }
  0xcd   :  { %633 = vst [vmem:[%s1091_s2 + $0x8] sm:$0xff] %v281_v39  ;;  %634 = vst [vmem:[%s1091_s2 + $0x10] sm:$0xff] %v322_v40 }
  0xce   :  { %v283_v41 = vpop.f32.mrf.mxu0  ;;  %v324_v42 = vpop.f32.mrf.mxu1 }
  0xcf   :  { %635 = vst [vmem:[%s1091_s2 + $0x18] sm:$0xff] %v283_v41  ;;  %638 = vst [vmem:[%s1092_s3] sm:$0xff] %v324_v42 }
  0xd0   :  { %v285_v43 = vpop.f32.mrf.mxu0  ;;  %v326_v44 = vpop.f32.mrf.mxu1 }
  0xd1   :  { %636 = vst [vmem:[%s1091_s2 + $0x20] sm:$0xff] %v285_v43  ;;  %637 = vst [vmem:[%s1091_s2 + $0x28] sm:$0xff] %v326_v44 }
  0xd2   :  { %v365_v45 = vpop.f32.mrf.mxu0  ;;  %v328_v46 = vpop.f32.mrf.mxu1 }
  0xd3   :  { %639 = vst [vmem:[%s1092_s3 + $0x8] sm:$0xff] %v365_v45  ;;  %641 = vst [vmem:[%s1092_s3 + $0x18] sm:$0xff] %v328_v46 }
  0xd4   :  { %v367_v47 = vpop.f32.mrf.mxu0  ;;  %v408_v48 = vpop.f32.mrf.mxu1 }
  0xd5   :  { %640 = vst [vmem:[%s1092_s3 + $0x10] sm:$0xff] %v367_v47  ;;  %644 = vst [vmem:[%s1093_s4] sm:$0xff] %v408_v48 }
  0xd6   :  { %v369_v49 = vpop.f32.mrf.mxu0  ;;  %v410_v50 = vpop.f32.mrf.mxu1 }
  0xd7   :  { %642 = vst [vmem:[%s1092_s3 + $0x20] sm:$0xff] %v369_v49  ;;  %645 = vst [vmem:[%s1093_s4 + $0x8] sm:$0xff] %v410_v50 }
  0xd8   :  { %v371_v51 = vpop.f32.mrf.mxu0  ;;  %v412_v52 = vpop.f32.mrf.mxu1 }
  0xd9   :  { %643 = vst [vmem:[%s1092_s3 + $0x28] sm:$0xff] %v371_v51  ;;  %647 = vst [vmem:[%s1093_s4 + $0x18] sm:$0xff] %v412_v52 }
  0xda   :  { %v451_v53 = vpop.f32.mrf.mxu0  ;;  %v414_v54 = vpop.f32.mrf.mxu1 }
  0xdb   :  { %646 = vst [vmem:[%s1093_s4 + $0x10] sm:$0xff] %v451_v53  ;;  %648 = vst [vmem:[%s1093_s4 + $0x20] sm:$0xff] %v414_v54 }
  0xdc   :  { %v453_v55 = vpop.f32.mrf.mxu0  ;;  %v494_v56 = vpop.f32.mrf.mxu1 }
  0xdd   :  { %650 = vst [vmem:[%s1094_s5] sm:$0xff] %v453_v55  ;;  %651 = vst [vmem:[%s1094_s5 + $0x8] sm:$0xff] %v494_v56 }
  0xde   :  { %v455_v57 = vpop.f32.mrf.mxu0  ;;  %v496_v58 = vpop.f32.mrf.mxu1 }
  0xdf   :  { %649 = vst [vmem:[%s1093_s4 + $0x28] sm:$0xff] %v455_v57  ;;  %652 = vst.msk [vmem:[%s1094_s5 + $0x10] sm:$0xff] %vm241_vm0, %v496_v58 }
  0xe0   :  { %v457_v59 = vpop.f32.mrf.mxu0  ;;  %v498_v60 = vpop.f32.mrf.mxu1 }
  0xe1   :  { %653 = vst [vmem:[%s1094_s5 + $0x18] sm:$0xff] %v457_v59  ;;  %654 = vst [vmem:[%s1094_s5 + $0x20] sm:$0xff] %v498_v60 }
  0xe2   :  { %v537_v61 = vpop.f32.mrf.mxu0  ;;  %v500_v62 = vpop.f32.mrf.mxu1 }
  0xe3   :  { %656 = vst [vmem:[%s1095_s6] sm:$0xff] %v537_v61  ;;  %655 = vst.msk [vmem:[%s1094_s5 + $0x28] sm:$0xff] %vm241_vm0, %v500_v62 }
  0xe4   :  { %v539_v63 = vpop.f32.mrf.mxu0  ;;  %v580_v0 = vpop.f32.mrf.mxu1 }
  0xe5   :  { %657 = vst [vmem:[%s1095_s6 + $0x8] sm:$0xff] %v539_v63  ;;  %658 = vst.msk [vmem:[%s1095_s6 + $0x10] sm:$0xff] %vm241_vm0, %v580_v0 }
  0xe6   :  { %v541_v1 = vpop.f32.mrf.mxu0  ;;  %v582_v2 = vpop.f32.mrf.mxu1 }
  0xe7   :  { %659 = vst [vmem:[%s1095_s6 + $0x18] sm:$0xff] %v541_v1  ;;  %662 = vst [vmem:[%s1096_s7] sm:$0xff] %v582_v2 }
  0xe8   :  { %v543_v3 = vpop.f32.mrf.mxu0  ;;  %v584_v4 = vpop.f32.mrf.mxu1 }
  0xe9   :  { %660 = vst [vmem:[%s1095_s6 + $0x20] sm:$0xff] %v543_v3  ;;  %661 = vst.msk [vmem:[%s1095_s6 + $0x28] sm:$0xff] %vm241_vm0, %v584_v4 }
  0xea   :  { %v623_v5 = vpop.f32.mrf.mxu0  ;;  %v586_v6 = vpop.f32.mrf.mxu1 }
  0xeb   :  { %663 = vst [vmem:[%s1096_s7 + $0x8] sm:$0xff] %v623_v5  ;;  %665 = vst [vmem:[%s1096_s7 + $0x18] sm:$0xff] %v586_v6 }
  0xec   :  { %v625_v7 = vpop.f32.mrf.mxu0 }
  0xed   :  { %664 = vst.msk [vmem:[%s1096_s7 + $0x10] sm:$0xff] %vm241_vm0, %v625_v7 }
  0xee   :  { %v627_v8 = vpop.f32.mrf.mxu0 }
  0xef   :  { %666 = vst [vmem:[%s1096_s7 + $0x20] sm:$0xff] %v627_v8 }
  0xf0   :  { %v629_v9 = vpop.f32.mrf.mxu0 }
  0xf1   :  { %667 = vst.msk [vmem:[%s1096_s7 + $0x28] sm:$0xff] %vm241_vm0, %v629_v9 }

// kernel: ga_block_forward.4
= control target key start
LH: loop header
LB: loop body
LE: loop exit
PB: predicated region body
PF: predicated region fallthrough
CT: control target
= control target key end

     0   :  { %s1595_s0 = inlined_call_operand.vmem [shape: f32[12,16], index: 0, kind: input, shape index: {}]   ;;  %s1596_s1 = inlined_call_operand.vmem [shape: bf16[2,12,8,56], index: 1, kind: input, shape index: {}]   ;;  %s1597_s2 = inlined_call_operand.vmem [shape: bf16[2,12,8,56], index: 2, kind: input, shape index: {}]   ;;  %s1598_s3 = inlined_call_operand.vmem [shape: bf16[2,12,8,56], index: 3, kind: input, shape index: {}]   ;;  %s1599_s4 = inlined_call_operand.vmem [shape: f32[2,12,8,1], index: 4, kind: input, shape index: {}]   ;;  %s1600_s5 = inlined_call_operand.vmem [shape: f32[2,12,1,8], index: 5, kind: input, shape index: {}]   ;;  %s1601_s6 = inlined_call_operand.vmem [shape: bf16[2,16,8,8], index: 6, kind: input, shape index: {}]   ;;  %s1602_s7 = inlined_call_operand.vmem [shape: f32[2,8,1], index: 7, kind: input, shape index: {}]   ;;  %s1603_s8 = inlined_call_operand.vmem [shape: f32[2,12,8,128], index: 8, kind: output, shape index: {}]  }
   0x1   :  { %1605 = sst [smem:[#allocation5_spill]] %s1595_s0 }
   0x2   :  { %1606 = sst [smem:[#allocation6_spill]] %s1596_s1 }
   0x3   :  { %13 = vsyncpa [#allocation3], 0  ;;  %s1291_s27 = smov 0   ;;  %s1293_s28 = smov 0  }
   0x4   :  { %s1295_s29 = smov 0   ;;  %s1297_s30 = smov 0  }
   0x5   :  { %s1299_s9 = smov 0  }
   0x6 LB: > { %s1063_s10 = sadd.s32 4294967295, %s1237_s9   ;;  %s28_s11 = sadd.s32 1, %s1229_s29  ;;  %s1237_s9 = sphi %s1299_s9, %s19_s9   ;;  %s1233_s30 = sphi %s1297_s30, %s1616_s30   ;;  %s1229_s29 = sphi %s1295_s29, %s1615_s29   ;;  %s1225_s28 = sphi %s1293_s28, %s1614_s28   ;;  %s1221_s27 = sphi %s1291_s27, %s1613_s27  }
   0x7   : > { %p29_p0 = scmp.ge.s32.totalorder %s28_s11, 12  ;;  %s31_s12 = sadd.s32 1, %s1233_s30 }
   0x8   : > { %p1065_p1 = scmp.ge.s32.totalorder %s1237_s9, 1  ;;  %p277_p2 = scmp.lt.s32.totalorder %s1237_s9, 25 }
   0x9   : > { %s1618_s11 = smov (%p29_p0, %s28_s11), 0  ;;  %s1620_s12 = smov (!%p29_p0, %s31_s12), %s1233_s30 }
   0xa   : > { %p1324_p3 = pnand %p1065_p1, %p277_p2  ;;  %p33_p4 = scmp.ge.s32.totalorder %s1620_s12, 2 }
   0xb   : > { %p1328_p5 = scmp.eq.s32.totalorder %s1063_s10, 0  ;;  %s1609_s0 = sld [smem:[#allocation5_spill]] }
   0xc   : > { %p1121_p6 = pneg %p1324_p3  ;;  %s1622_s12 = smov (%p33_p4, %s1620_s12), 0 }
   0xe   : > { %p1341_p7 = pnand %p1328_p5, %p1121_p6 }
  0x10   : > { %p1182_p9 = pneg %p1341_p7 }
  0x11   : > { %s289_s17 = sshll.u32 %s1609_s0, 4  ;;  %s290_s17 = int_to_ptr.vmem [resolvable:$true] %s289_s17 }
  0x12   : > { %s1180_s19 = scalar_lea.vmem %s290_s17, 256  ;;  %p1188_p12 = scmp.lt.s32.totalorder %s290_s17, %s290_s17 }
  0x13   : > { %p1181_p8 = scmp.ne.s32.totalorder %s290_s17, %s1180_s19  ;;  %p1189_p13 = scmp.lt.s32.totalorder %s1180_s19, %s1180_s19 }
  0x15   : > { %p1183_p10 = pnand %p1182_p9, %p1181_p8  ;;  %p1190_p0 = por %p1189_p13, %p1188_p12 }
  0x17   : > { %p1184_p11 = pneg %p1183_p10 }
  0x19   : > { %p1191_p1 = pnand %p1190_p0, %p1184_p11 }
  0x1b   : > { %1194 = shalt.err (!%p1191_p1)
}
  0x1c   : > { %s1239_s20 = smov [#allocation2]   ;;  %s1240_s21 = smov 128  }
  0x1d   : > { %s1241_s22 = smov 8   ;;  %374 = sbr.rel (%p1324_p3) target bundleno = 895 (0x37f), region = 52 }
  0x1e   : > { %1124 = dma.vmem_to_smem (!%p1341_p7), %s290_s17, 256, %s1239_s20, [#allocation3], %s1240_s21, %s1240_s21, %s1241_s22  }
  0x22   : > { %1216 = dma.done.wait (%p1328_p5), [#allocation3], 256  }
  0x23   : > { %1218 = vsyncadd (%p1328_p5), [#allocation3], 4294967040 }
  0x24   : > { %380 = sfence }
  0x25   : > { %p455_p2 = scmp.lt.s32.totalorder %s1225_s28, 1  ;;  %p457_p4 = scmp.lt.s32.totalorder %s1221_s27, 11  ;;  %v1242_v0 = vmov 0.0   ;;  %vm1243_vm0 = vmmov 0   ;;  %v1244_v1 = vmov 0   ;;  %vm520_vm1 = vcmask 457728  }
  0x26   : > { %1104 = vmatprep.subr.bf16.mxu0 %v1242_v0  ;;  %1106 = vmatprep.mubr.msk.bf16.mxu0 %vm1243_vm0, %v1242_v0  ;;  %s1611_s1 = sld [smem:[#allocation6_spill]]  ;;  %s1384_s22 = sshll.u32 %s1221_s27, 7  ;;  %vm702_vm2 = vcmask 64512   ;;  %vm726_vm3 = vcmask 1043456   ;;  %vm834_vm4 = vcmask 7168   ;;  %vm836_vm5 = vcmask 15360  }
  0x27   : > { %s1624_s28 = smov (!%p455_p2, %s1225_s28), 1  ;;  %1174 = vset.pattern.permute.xlu0 %v1244_v1  ;;  %1175 = vset.pattern.permute.xlu1 %v1244_v1  ;;  %s576_s13 = sld [smem:[#allocation2 + %s1384_s22]]  ;;  %vm838_vm6 = vcmask 23552   ;;  %vm840_vm7 = vcmask 31744   ;;  %vm842_vm8 = vcmask 39936   ;;  %vm844_vm9 = vcmask 48128  }
  0x28   : > { %s458_s23 = scalar_select %p457_p4, %s1221_s27, 11  ;;  %1110 = vmatprep.subr.bf16.mxu1 %v1242_v0  ;;  %1112 = vmatprep.mubr.msk.bf16.mxu1 %vm1243_vm0, %v1242_v0  ;;  %vm846_vm10 = vcmask 56320   ;;  %vm849_vm11 = vcmask 72704   ;;  %vm851_vm12 = vcmask 80896   ;;  %vm853_vm13 = vcmask 89088  }
  0x29   : > { %s1116_s24 = smul.u32 12, %s1624_s28  ;;  %s590_s17 = sadd.s32 2, %s1384_s22  ;;  %vm855_vm14 = vcmask 97280   ;;  %vm857_vm15 = vcmask 105472   ;;  %vm859_vm0 = vcmask 113664  }
  0x2a   : > { %s1399_s19 = sld [smem:[#allocation2 + %s590_s17]]  ;;  %s606_s20 = sadd.s32 4, %s1384_s22 }
  0x2b   : > { %s1362_s25 = sadd.s32 %s1116_s24, %s458_s23  ;;  %s1099_s23 = sshll.u32 %s1624_s28, 6 }
  0x2c   : > { %s1365_s26 = sshll.u32 %s1362_s25, 2  ;;  %s1604_s10 = sshll.u32 %s1362_s25, 3 }
  0x2d   : > { %s470_s15 = scalar_lea.vmem %s1597_s2, %s1365_s26  ;;  %s486_s18 = scalar_lea.vmem %s1599_s4, %s1604_s10  ;;  %v579_v9 = vstv %s576_s13 }
  0x2e   : > { %v513_v2 = vld [vmem:[%s470_s15] sm:$0xf]  ;;  %s462_s21 = scalar_lea.vmem %s1611_s1, %s1365_s26  ;;  %s582_s24 = sadd.s32 1, %s1384_s22 }
  0x2f   : > { %v525_v3 = vsel %vm520_vm1, %v513_v2, 0  ;;  %v514_v4 = vld [vmem:[%s486_s18] sm:$0xff]  ;;  %s1392_s16 = scalar_lea.vmem %s1601_s6, %s1099_s23  ;;  %s583_s27 = sld [smem:[#allocation2 + %s582_s24]] }
  0x30   : > { %1105 = vmatpush3.bf16.xpose.msra.mxu0 %v525_v3  ;;  %517 = vperm.xlu0 %1174, %v514_v4   ;;  %v512_v5 = vld [vmem:[%s462_s21] sm:$0xf]  ;;  %s598_s18 = sadd.s32 3, %s1384_s22  ;;  %s493_s1 = scalar_lea.vmem %s1600_s5, %s1362_s25  ;;  %v1411_v10 = vld [vmem:[%s1392_s16 + $0x8] sm:$0xff]   ;;  %v595_v18 = vstv %s1399_s19  ;;  %v1425_v19 = vld [vmem:[%s1392_s16 + $0x10] sm:$0xff]  }
  0x31   : > { %v1397_v6 = vld [vmem:[%s1392_s16] sm:$0xff]   ;;  %s1402_s21 = sld [smem:[#allocation2 + %s598_s18]]  ;;  %s614_s23 = sadd.s32 5, %s1384_s22  ;;  %v594_v17 = vunpack.c.l.bf16 %v1411_v10  ;;  %v602_v23 = vunpack.c.h.bf16 %v1411_v10  ;;  %v610_v28 = vunpack.c.l.bf16 %v1425_v19  ;;  %v1442_v30 = vld [vmem:[%s1392_s16 + $0x18] sm:$0xff]   ;;  %v618_v34 = vunpack.c.h.bf16 %v1425_v19  ;;  %v1476_v49 = vld [vmem:[%s1392_s16 + $0x28] sm:$0xff]  }
  0x32   : > { %v578_v7 = vunpack.c.l.bf16 %v1397_v6  ;;  %s1413_s24 = sld [smem:[#allocation2 + %s606_s20]]  ;;  %v586_v11 = vunpack.c.h.bf16 %v1397_v6  ;;  %s622_s14 = sadd.s32 6, %s1384_s22  ;;  %v1079_v13 = vld [vmem:[%s493_s1] ss:$0 sm:$0xff]  ;;  %v626_v38 = vunpack.c.l.bf16 %v1442_v30  ;;  %v634_v43 = vunpack.c.h.bf16 %v1442_v30  ;;  %v1489_v58 = vld [vmem:[%s1392_s16 + $0x30] sm:$0xff]   ;;  %v1499_v3 = vld [vmem:[%s1392_s16 + $0x38] sm:$0xff]  }
  0x33   : > { %s1417_s0 = sld [smem:[#allocation2 + %s614_s23]]  ;;  %s630_s10 = sadd.s32 7, %s1384_s22  ;;  %v596_v27 = vmul.f32 %v595_v18, %v594_v17  ;;  %v1459_v40 = vld [vmem:[%s1392_s16 + $0x20] sm:$0xff]   ;;  %v658_v56 = vunpack.c.l.bf16 %v1476_v49  ;;  %v666_v61 = vunpack.c.h.bf16 %v1476_v49  ;;  %v674_v1 = vunpack.c.l.bf16 %v1489_v58 }
  0x34   : > { %v580_v16 = vmul.f32 %v579_v9, %v578_v7  ;;  %s1427_s13 = sld [smem:[#allocation2 + %s622_s14]]  ;;  %s638_s1 = sadd.s32 8, %s1384_s22  ;;  %v642_v47 = vunpack.c.l.bf16 %v1459_v40  ;;  %v650_v52 = vunpack.c.h.bf16 %v1459_v40 }
  0x35   : > { %v587_v14 = vstv %s583_s27  ;;  %s1434_s15 = sld [smem:[#allocation2 + %s630_s10]]  ;;  %s646_s17 = sadd.s32 9, %s1384_s22 }
  0x36   : > { %v588_v22 = vmul.f32 %v587_v14, %v586_v11  ;;  %s1444_s27 = sld [smem:[#allocation2 + %s638_s1]]  ;;  %s654_s18 = sadd.s32 10, %s1384_s22  ;;  %v690_v14 = vunpack.c.l.bf16 %v1499_v3 }
  0x37   : > { %1107 = vmatmul.mubr.msk.bf16.vlgmr.msra.gmra.mxu0 %vm520_vm1, %v512_v5  ;;  %v603_v24 = vstv %s1402_s21  ;;  %s1451_s19 = sld [smem:[#allocation2 + %s646_s17]]  ;;  %s662_s20 = sadd.s32 11, %s1384_s22 }
  0x38   : > { %v611_v29 = vstv %s1413_s24  ;;  %v604_v33 = vmul.f32 %v603_v24, %v602_v23  ;;  %s1461_s21 = sld [smem:[#allocation2 + %s654_s18]]  ;;  %s670_s23 = sadd.s32 12, %s1384_s22 }
  0x39   : > { %v619_v35 = vstv %s1417_s0  ;;  %v612_v37 = vmul.f32 %v611_v29, %v610_v28  ;;  %s1468_s24 = sld [smem:[#allocation2 + %s662_s20]]  ;;  %s678_s14 = sadd.s32 13, %s1384_s22 }
  0x3a   : > { %v627_v39 = vstv %s1427_s13  ;;  %v620_v42 = vmul.f32 %v619_v35, %v618_v34  ;;  %s671_s0 = sld [smem:[#allocation2 + %s670_s23]]  ;;  %s686_s10 = sadd.s32 14, %s1384_s22 }
  0x3b   : > { %v635_v44 = vstv %s1434_s15  ;;  %v628_v46 = vmul.f32 %v627_v39, %v626_v38  ;;  %s679_s13 = sld [smem:[#allocation2 + %s678_s14]]  ;;  %s694_s1 = sadd.s32 15, %s1384_s22 }
  0x3c   : > { %v643_v48 = vstv %s1444_s27  ;;  %v636_v51 = vmul.f32 %v635_v44, %v634_v43  ;;  %s687_s15 = sld [smem:[#allocation2 + %s686_s10]]  ;;  %s1076_s22 = sshll.u32 %s1624_s28, 3 }
  0x3d   : > { %v651_v53 = vstv %s1451_s19  ;;  %v644_v55 = vmul.f32 %v643_v48, %v642_v47  ;;  %s695_s17 = sld [smem:[#allocation2 + %s694_s1]]  ;;  %s502_s18 = scalar_lea.vmem %s1602_s7, %s1076_s22 }
  0x3e   : > { %v659_v57 = vstv %s1461_s21  ;;  %v652_v60 = vmul.f32 %v651_v53, %v650_v52  ;;  %v714_v39 = vld [vmem:[%s502_s18] sm:$0xff]  ;;  %s478_s21 = scalar_lea.vmem %s1598_s3, %s1365_s26  ;;  %s1245_s28 = smov 56  }
  0x3f   : > { %v667_v62 = vstv %s1468_s24  ;;  %v660_v0 = vmul.f32 %v659_v57, %v658_v56  ;;  %s1612_s26 = sshll.u32 %s1362_s25, 3 }
  0x40   : > { %v675_v2 = vstv %s671_s0  ;;  %v668_v5 = vmul.f32 %v667_v62, %v666_v61  ;;  %s510_s14 = scalar_lea.vmem %s1603_s8, %s1612_s26 }
  0x41   : > { %v683_v9 = vstv %s679_s13 }
  0xab   : > { %v518_v8 = vpop.permute.xlu0 %517 }
  0xf7   : > { %v561_v12 = vpop.f32.mrf.mxu0 }
  0xf8   : > { %v562_v15 = vadd.f32 %v561_v12, %v518_v8  ;;  %v682_v8 = vunpack.c.h.bf16 %v1489_v58 }
  0xf9   : > { %v1108_v20 = vpop.f32.mrf.mxu0 }
  0xfa   : > { %v574_v21 = vadd.f32 %v1079_v13, %v562_v15  ;;  %v676_v13 = vmul.f32 %v675_v2, %v674_v1  ;;  %v691_v15 = vstv %s687_s15  ;;  %v684_v18 = vmul.f32 %v683_v9, %v682_v8 }
  0xfb   : > { %v564_v25 = vpop.f32.mrf.mxu0  ;;  %v698_v20 = vunpack.c.h.bf16 %v1499_v3  ;;  %v692_v24 = vmul.f32 %v691_v15, %v690_v14 }
  0xfc   : > { %v581_v26 = vadd.f32 %v580_v16, %v574_v21  ;;  %v699_v21 = vstv %s695_s17 }
  0xfd   : > { %v1109_v31 = vpop.f32.mrf.mxu0 }
  0xfe   : > { %v589_v32 = vadd.f32 %v588_v22, %v581_v26  ;;  %v700_v26 = vmul.f32 %v699_v21, %v698_v20 }
 0x100   : > { %v597_v36 = vadd.f32 %v596_v27, %v589_v32 }
 0x102   : > { %v605_v41 = vadd.f32 %v604_v33, %v597_v36 }
 0x104   : > { %v613_v45 = vadd.f32 %v612_v37, %v605_v41  ;;  %v722_v41 = vld [vmem:[%s478_s21] sm:$0xf] }
 0x106   : > { %v621_v50 = vadd.f32 %v620_v42, %v613_v45  ;;  %v728_v42 = vsel %vm726_vm3, %v722_v41, 0  ;;  %vm861_vm3 = vcmask 121856  }
 0x107   : > { %1111 = vmatpush3.bf16.msra.mxu1 %v728_v42 }
 0x108   : > { %v629_v54 = vadd.f32 %v628_v46, %v621_v50 }
 0x10a   : > { %v637_v59 = vadd.f32 %v636_v51, %v629_v54 }
 0x10c   : > { %v645_v63 = vadd.f32 %v644_v55, %v637_v59 }
 0x10e   : > { %v653_v4 = vadd.f32 %v652_v60, %v645_v63 }
 0x110   : > { %v661_v12 = vadd.f32 %v660_v0, %v653_v4 }
 0x112   : > { %v669_v16 = vadd.f32 %v668_v5, %v661_v12 }
 0x114   : > { %v677_v22 = vadd.f32 %v676_v13, %v669_v16 }
 0x116   : > { %v685_v25 = vadd.f32 %v684_v18, %v677_v22 }
 0x118   : > { %v693_v27 = vadd.f32 %v692_v24, %v685_v25 }
 0x11a   : > { %v701_v29 = vadd.f32 %v700_v26, %v693_v27 }
 0x11c   : > { %v703_v31 = vsel %vm702_vm2, %v701_v29, -inf }
 0x11d   : > { %704 = vmax.xlane.f32.xlu0 %v703_v31 }
 0x1a6   : > { %v705_v32 = vpop.xlane.xlu0 %704 }
 0x1a7   : > { %v706_v33 = vsub.f32 %v701_v29, %v705_v32 }
 0x1a9   : > { %v707_v35 = vmul.f32 1.442695, %v706_v33 }
 0x1ab   : > { %1176 = vpow2.f32 %v707_v35 }
 0x1b8   : > { %v1177_v36 = vpop.eup %1176 }
 0x1b9   : > { %v709_v37 = vsel %vm702_vm2, %v1177_v36, 0.0 }
 0x1ba   : > { %710 = vadd.xlane.f32.xlu1 %v709_v37 }
 0x1cb   : > { %717 = vperm.xlu1 %1175, %v714_v39  }
 0x243   : > { %v711_v44 = vpop.xlane.xlu1 %710 }
 0x244   : > { %1178 = vrcp.f32 %v711_v44 }
 0x247   : > { %v718_v46 = vpop.permute.xlu1 %717 }
 0x251   : > { %v1179_v45 = vpop.eup %1178 }
 0x252   : > { %v713_v48 = vmul.f32 %v1179_v45, %v1177_v36 }
 0x254   : > { %v720_v50 = vmul.f32 %v718_v46, %v713_v48 }
 0x256   : > { %v721_v51 = vpack.c.bf16 %v720_v50, %v720_v50  ;;  %v774_v53 = vmul.f32 %v720_v50, %v586_v11  ;;  %v770_v54 = vmul.f32 %v720_v50, %v578_v7  ;;  %v778_v59 = vmul.f32 %v720_v50, %v594_v17 }
 0x257   : > { %v798_v60 = vmul.f32 %v720_v50, %v634_v43  ;;  %v782_v6 = vmul.f32 %v720_v50, %v602_v23  ;;  %v806_v7 = vmul.f32 %v720_v50, %v650_v52  ;;  %v786_v43 = vmul.f32 %v720_v50, %v610_v28 }
 0x258   : > { %1113 = vmatmul.mubr.msk.bf16.vlgmr.msra.gmra.mxu1 %vm702_vm2, %v721_v51  ;;  %v775_v55 = vsel %vm702_vm2, %v774_v53, 0.0  ;;  %v771_v57 = vsel %vm702_vm2, %v770_v54, 0.0  ;;  %v779_v62 = vsel %vm702_vm2, %v778_v59, 0.0  ;;  %v814_v0 = vmul.f32 %v720_v50, %v666_v61 }
 0x259   : > { %776 = vadd.xlane.f32.xlu0 %v775_v55  ;;  %772 = vadd.xlane.f32.xlu1 %v771_v57  ;;  %v799_v11 = vsel %vm702_vm2, %v798_v60, 0.0  ;;  %v783_v63 = vsel %vm702_vm2, %v782_v6, 0.0  ;;  %v807_v17 = vsel %vm702_vm2, %v806_v7, 0.0  ;;  %v787_v10 = vsel %vm702_vm2, %v786_v43, 0.0 }
 0x25a   : > { %v815_v23 = vsel %vm702_vm2, %v814_v0, 0.0  ;;  %v790_v52 = vmul.f32 %v720_v50, %v618_v34  ;;  %v822_v2 = vmul.f32 %v720_v50, %v682_v8  ;;  %v794_v61 = vmul.f32 %v720_v50, %v626_v38 }
 0x25b   : > { %v830_v5 = vmul.f32 %v720_v50, %v698_v20  ;;  %v802_v8 = vmul.f32 %v720_v50, %v642_v47  ;;  %v810_v30 = vmul.f32 %v720_v50, %v658_v56  ;;  %v818_v12 = vmul.f32 %v720_v50, %v674_v1 }
 0x25c   : > { %v791_v4 = vsel %vm702_vm2, %v790_v52, 0.0  ;;  %v823_v28 = vsel %vm702_vm2, %v822_v2, 0.0  ;;  %v795_v19 = vsel %vm702_vm2, %v794_v61, 0.0  ;;  %v826_v40 = vmul.f32 %v720_v50, %v690_v14 }
 0x25d   : > { %780 = vadd.xlane.f32.xlu0 %v779_v62  ;;  %800 = vadd.xlane.f32.xlu1 %v799_v11  ;;  %v831_v34 = vsel %vm702_vm2, %v830_v5, 0.0  ;;  %v803_v9 = vsel %vm702_vm2, %v802_v8, 0.0  ;;  %v811_v38 = vsel %vm702_vm2, %v810_v30, 0.0  ;;  %v819_v13 = vsel %vm702_vm2, %v818_v12, 0.0 }
 0x25e   : > { %v827_v47 = vsel %vm702_vm2, %v826_v40, 0.0 }
 0x261   : > { %784 = vadd.xlane.f32.xlu0 %v783_v63  ;;  %808 = vadd.xlane.f32.xlu1 %v807_v17 }
 0x265   : > { %788 = vadd.xlane.f32.xlu0 %v787_v10  ;;  %816 = vadd.xlane.f32.xlu1 %v815_v23 }
 0x269   : > { %792 = vadd.xlane.f32.xlu0 %v791_v4  ;;  %824 = vadd.xlane.f32.xlu1 %v823_v28 }
 0x26d   : > { %796 = vadd.xlane.f32.xlu0 %v795_v19  ;;  %832 = vadd.xlane.f32.xlu1 %v831_v34 }
 0x271   : > { %804 = vadd.xlane.f32.xlu0 %v803_v9 }
 0x275   : > { %812 = vadd.xlane.f32.xlu0 %v811_v38 }
 0x279   : > { %820 = vadd.xlane.f32.xlu0 %v819_v13 }
 0x27d   : > { %828 = vadd.xlane.f32.xlu0 %v827_v47 }
 0x2e2   : > { %v777_v15 = vpop.xlane.xlu0 %776  ;;  %v773_v49 = vpop.xlane.xlu1 %772 }
 0x2e3   : > { %v835_v58 = vsel %vm834_vm4, %v773_v49, %v777_v15 }
 0x2e6   : > { %v781_v16 = vpop.xlane.xlu0 %780  ;;  %v801_v20 = vpop.xlane.xlu1 %800 }
 0x2e7   : > { %v837_v21 = vsel %vm836_vm5, %v835_v58, %v781_v16 }
 0x2ea   : > { %v785_v56 = vpop.xlane.xlu0 %784  ;;  %v809_v14 = vpop.xlane.xlu1 %808 }
 0x2eb   : > { %v839_v3 = vsel %vm838_vm6, %v837_v21, %v785_v56 }
 0x2ee   : > { %v789_v18 = vpop.xlane.xlu0 %788  ;;  %v817_v31 = vpop.xlane.xlu1 %816 }
 0x2ef   : > { %v841_v22 = vsel %vm840_vm7, %v839_v3, %v789_v18 }
 0x2f2   : > { %v793_v1 = vpop.xlane.xlu0 %792  ;;  %v825_v37 = vpop.xlane.xlu1 %824 }
 0x2f3   : > { %v843_v24 = vsel %vm842_vm8, %v841_v22, %v793_v1 }
 0x2f6   : > { %v797_v25 = vpop.xlane.xlu0 %796  ;;  %v833_v46 = vpop.xlane.xlu1 %832 }
 0x2f7   : > { %v845_v26 = vsel %vm844_vm9, %v843_v24, %v797_v25 }
 0x2f8   : > { %v847_v29 = vsel %vm846_vm10, %v845_v26, %v801_v20 }
 0x2fa   : > { %v805_v27 = vpop.xlane.xlu0 %804 }
 0x2fb   : > { %v848_v32 = vsel %vm702_vm2, %v847_v29, %v805_v27  ;;  %vm868_vm2 = vcmask 588800  }
 0x2fc   : > { %v850_v35 = vsel %vm849_vm11, %v848_v32, %v809_v14 }
 0x2fe   : > { %v813_v33 = vpop.xlane.xlu0 %812 }
 0x2ff   : > { %v852_v36 = vsel %vm851_vm12, %v850_v35, %v813_v33 }
 0x300   : > { %v854_v41 = vsel %vm853_vm13, %v852_v36, %v817_v31 }
 0x302   : > { %v821_v39 = vpop.xlane.xlu0 %820 }
 0x303   : > { %v856_v42 = vsel %vm855_vm14, %v854_v41, %v821_v39 }
 0x304   : > { %v858_v45 = vsel %vm857_vm15, %v856_v42, %v825_v37 }
 0x306   : > { %v829_v44 = vpop.xlane.xlu0 %828 }
 0x307   : > { %v860_v48 = vsel %vm859_vm0, %v858_v45, %v829_v44 }
 0x308   : > { %v862_v50 = vsel %vm861_vm3, %v860_v48, %v833_v46 }
 0x309   : > { %864 = vrot.lane.b32.xlu0 %v862_v50, %s1245_s28 }
 0x318   : > { %v764_v51 = vpop.f32.mrf.mxu1 }
 0x31a   : > { %v1114_v53 = vpop.f32.mrf.mxu1 }
 0x31c   : > { %v767_v54 = vpop.f32.mrf.mxu1 }
 0x31e   : > { %v1115_v55 = vpop.f32.mrf.mxu1 }
 0x37b   : > { %v865_v57 = vpop.permute.xlu0 %864 }
 0x37c   : > { %v867_v59 = vsel %vm520_vm1, %v764_v51, %v865_v57 }
 0x37d   : > { %v869_v60 = vsel %vm868_vm2, %v867_v59, 0.0 }
 0x37e   : > { %870 = vst [vmem:[%s510_s14] sm:$0xff] %v869_v60 }
 0x37f PF: > { %s19_s9 = sadd.s32 1, %s1237_s9   ;;  %s1613_s27 = smov %s1229_s29 }
 0x380   : > { %p16_p3 = scmp.ge.s32.totalorder %s19_s9, 26   ;;  %s1614_s28 = smov %s1233_s30 }
 0x381   : > { %s1615_s29 = smov %s1618_s11  ;;  %s1616_s30 = smov %s1622_s12 }
 0x382   :  { %18 = sbr.rel (!%p16_p3) target bundleno = 6 (0x6), region = 120 }
 0x387   :  { %898 = vsyncpa [#allocation3], 1 }
 0x388   :  { %900 = vsyncpa [#allocation3 + $0x1], 1 }

// kernel: ga_block_forward.5
= control target key start
LH: loop header
LB: loop body
LE: loop exit
PB: predicated region body
PF: predicated region fallthrough
CT: control target
= control target key end

     0   :  { %s2796_s0 = inlined_call_operand.vmem [shape: f32[2,8,1248], index: 0, kind: input, shape index: {}]   ;;  %s2797_s1 = inlined_call_operand.vmem [shape: f32[2,8,32], index: 1, kind: input, shape index: {}]   ;;  %s2798_s2 = inlined_call_operand.vmem [shape: f32[2,8,1], index: 2, kind: input, shape index: {}]   ;;  %s2799_s3 = inlined_call_operand.vmem [shape: bf16[1248,32], index: 3, kind: input, shape index: {}]   ;;  %s2800_s4 = inlined_call_operand.vmem [shape: f32[1,32], index: 4, kind: input, shape index: {}]   ;;  %s2801_s5 = inlined_call_operand.vmem [shape: f32[1,32], index: 5, kind: input, shape index: {}]   ;;  %s2802_s6 = inlined_call_operand.vmem [shape: f32[1,32], index: 6, kind: input, shape index: {}]   ;;  %s2803_s7 = inlined_call_operand.vmem [shape: bf16[32,32], index: 7, kind: input, shape index: {}]   ;;  %s2804_s8 = inlined_call_operand.vmem [shape: f32[1,32], index: 8, kind: input, shape index: {}]   ;;  %s2805_s9 = inlined_call_operand.vmem [shape: bf16[32,32], index: 9, kind: input, shape index: {}]   ;;  %s2806_s10 = inlined_call_operand.vmem [shape: f32[1,32], index: 10, kind: input, shape index: {}]   ;;  %s2807_s11 = inlined_call_operand.vmem [shape: bf16[32,32], index: 11, kind: input, shape index: {}]   ;;  %s2808_s12 = inlined_call_operand.vmem [shape: f32[1,32], index: 12, kind: input, shape index: {}]   ;;  %s2809_s13 = inlined_call_operand.vmem [shape: f32[1,32], index: 13, kind: input, shape index: {}]   ;;  %s2810_s14 = inlined_call_operand.vmem [shape: f32[1,32], index: 14, kind: input, shape index: {}]   ;;  %s2811_s15 = inlined_call_operand.hbm [shape: f32[2,8,32], index: 15, kind: output, shape index: {}]  }
   0x1   :  { %2818 = sst [smem:[#allocation11_spill]] %s2796_s0 }
   0x2   :  { %2819 = sst [smem:[#allocation12_spill]] %s2797_s1 }
   0x3   :  { %2820 = sst [smem:[#allocation13_spill]] %s2798_s2 }
   0x4   :  { %2821 = sst [smem:[#allocation14_spill]] %s2811_s15 }
   0x5   :  { %20 = vsyncpa [#allocation3], 0 }
   0x6   :  { %22 = vsyncpa [#allocation3 + $0x1], 0  ;;  %s2369_s18 = smov 0   ;;  %s2371_s19 = smov 0  }
   0x7   :  { %s2373_s20 = smov 0   ;;  %s2375_s21 = smov 0  }
   0x8   :  { %s2377_s22 = smov 0   ;;  %s2379_s23 = smov 0  }
   0x9 LB: > { %2822 = sst [smem:[#allocation5_spill]] %s2263_s18  ;;  %s1829_s24 = sadd.s32 4294967295, %s2283_s23   ;;  %s2283_s23 = sphi %s2379_s23, %s28_s23   ;;  %s2279_s22 = sphi %s2377_s22, %s2840_s22   ;;  %s2275_s21 = sphi %s2375_s21, %s2839_s21   ;;  %s2271_s20 = sphi %s2373_s20, %s2838_s20   ;;  %s2267_s19 = sphi %s2371_s19, %s2842_s19   ;;  %s2263_s18 = sphi %s2369_s18, %s2841_s18  }
   0xa   : > { %2823 = sst [smem:[#allocation6_spill]] %s2271_s20  ;;  %s1830_s25 = sadd.s32 4294967294, %s2283_s23  }
   0xb   : > { %2824 = sst [smem:[#allocation7_spill]] %s2279_s22  ;;  %s40_s26 = sadd.s32 1, %s2279_s22 }
   0xc   : > { %s385_s27 = sadd.s32 1, %s2271_s20  ;;  %p42_p0 = scmp.ge.s32.totalorder %s40_s26, 2 }
   0xd   : > { %p395_p1 = scmp.ne.s32.totalorder %s2271_s20, %s2267_s19  ;;  %p396_p2 = scmp.eq.s32.totalorder %s1829_s24, 1 }
   0xe   : > { %p401_p3 = scmp.ne.s32.totalorder %s2267_s19, %s2263_s18  ;;  %s2844_s26 = smov (%p42_p0, %s40_s26), 0 }
   0xf   : > { %2825 = sst [smem:[#allocation8_spill]] %s2844_s26  ;;  %p2409_p4 = por %p396_p2, %p395_p1 }
  0x10   : > { %p402_p5 = scmp.eq.s32.totalorder %s1830_s25, 1  ;;  %s380_s29 = ssub.s32 %s2279_s22, %s2844_s26 }
  0x11   : > { %p1833_p6 = scmp.ge.s32.totalorder %s2283_s23, 1  ;;  %p383_p7 = scmp.eq.s32.totalorder %s380_s29, 0 }
  0x12   : > { %p2416_p8 = por %p402_p5, %p401_p3  ;;  %p488_p9 = scmp.lt.s32.totalorder %s2283_s23, 3 }
  0x13   : > { %s2422_s16 = scalar_select %p383_p7, %s2271_s20, %s385_s27  }
  0x14   : > { %s2827_s30 = scalar_select %p2416_p8, 1, 0 }
  0x15   : > { %2829 = sst [smem:[#allocation10_spill]] %s2422_s16  ;;  %p489_p10 = pnand %p1833_p6, %p488_p9 }
  0x16   : > { %2828 = sst [smem:[#allocation9_spill]] %s2827_s30  ;;  %p554_p11 = scmp.lt.s32.totalorder (!%p489_p10), %s2275_s21, 1 }
  0x17   : > { %492 = sbr.rel (%p489_p10) target bundleno = 1574 (0x626), region = 80  ;;  %s2830_s0 = sld [smem:[#allocation11_spill]] (!%p489_p10) }
  0x18   : > { %s2831_s2 = sld [smem:[#allocation13_spill]] (!%p489_p10)  ;;  %s551_s17 = sand.u32 (!%p489_p10), 1, %s2267_s19  }
  0x19   : > { %s2832_s1 = sld [smem:[#allocation12_spill]] (!%p489_p10) }
  0x1c   : > { %v2119_v0 = vld [vmem:[%s2799_s3 + $0x78] sm:$0xff]   ;;  %v2285_v3 = vmov 0   ;;  %v2123_v5 = vld [vmem:[%s2799_s3 + $0x70] sm:$0xff]   ;;  %v2127_v9 = vld [vmem:[%s2799_s3 + $0x68] sm:$0xff]   ;;  %s2490_s25 = scalar_select %p554_p11, %s2275_s21, 1  ;;  %vm1231_vm0 = vcmask 785408  }
  0x1d   : > { %v2120_v1 = vld [vmem:[%s2799_s3 + $0x38] sm:$0xff]   ;;  %1938 = vmatprep.subr.bf16.mxu0 %v2119_v0  ;;  %2118 = vset.pattern.permute.xlu0 %v2285_v3  ;;  %v2124_v6 = vld [vmem:[%s2799_s3 + $0x30] sm:$0xff]   ;;  %v2128_v10 = vld [vmem:[%s2799_s3 + $0x28] sm:$0xff]   ;;  %vm1444_vm1 = vcmask 261120   ;;  %vm2287_vm2 = vmmov 0  }
  0x1e   : > { %v2121_v2 = vld [vmem:[%s2799_s3 + $0xf8] sm:$0xff]   ;;  %1939 = vmatpush3.bf16.msra.mxu0 %v2120_v1  ;;  %v2125_v7 = vld [vmem:[%s2799_s3 + $0xf0] sm:$0xff]   ;;  %v2129_v11 = vld [vmem:[%s2799_s3 + $0xe8] sm:$0xff]   ;;  %s2059_s18 = smul.u32 80, %s2490_s25  ;;  %s1836_s27 = sshll.u32 %s2490_s25, 3 }
  0x1f   : > { %v2122_v4 = vld [vmem:[%s2799_s3 + $0xb8] sm:$0xff]   ;;  %1960 = vmatprep.subr.bf16.mxu1 %v2121_v2  ;;  %1940 = vmatprep.subr.bf16.mxu0 %v2123_v5  ;;  %v2126_v8 = vld [vmem:[%s2799_s3 + $0xb0] sm:$0xff]   ;;  %v2130_v12 = vld [vmem:[%s2799_s3 + $0xa8] sm:$0xff]   ;;  %s576_s16 = scalar_lea.vmem %s2831_s2, %s1836_s27  ;;  %s569_s24 = scalar_lea.vmem %s2832_s1, %s1836_s27 }
  0x20   : > { %1961 = vmatpush3.bf16.msra.mxu1 %v2122_v4  ;;  %v2131_v13 = vld [vmem:[%s2799_s3 + $0x60] sm:$0xff]   ;;  %v2135_v17 = vld [vmem:[%s2799_s3 + $0x58] sm:$0xff]   ;;  %v2139_v21 = vld [vmem:[%s2799_s3 + $0x50] sm:$0xff]   ;;  %s2520_s20 = scalar_lea.vmem %s2830_s0, %s2059_s18  ;;  %s1708_s2 = scalar_lea.sflag [#allocation3], %s551_s17 }
  0x21   : > { %1962 = vmatprep.subr.bf16.mxu1 %v2125_v7  ;;  %v2132_v14 = vld [vmem:[%s2799_s3 + $0x20] sm:$0xff]   ;;  %v2136_v18 = vld [vmem:[%s2799_s3 + $0x18] sm:$0xff]   ;;  %v2140_v22 = vld [vmem:[%s2799_s3 + $0x10] sm:$0xff]   ;;  %s2288_s27 = smov [#allocation2]  }
  0x22   : > { %1941 = vmatpush3.bf16.msra.mxu0 %v2124_v6  ;;  %v2133_v15 = vld [vmem:[%s2799_s3 + $0xe0] sm:$0xff]   ;;  %v2137_v19 = vld [vmem:[%s2799_s3 + $0xd8] sm:$0xff]   ;;  %v2141_v23 = vld [vmem:[%s2799_s3 + $0xd0] sm:$0xff]   ;;  %s2211_s15 = sshll.u32 %s2288_s27, 4  ;;  %s2212_s15 = int_to_ptr.vmem [resolvable:$false] %s2211_s15 }
  0x23   : > { %1942 = vmatprep.subr.bf16.mxu0 %v2127_v9  ;;  %v2134_v16 = vld [vmem:[%s2799_s3 + $0xa0] sm:$0xff]   ;;  %v2138_v20 = vld [vmem:[%s2799_s3 + $0x98] sm:$0xff]   ;;  %v2142_v24 = vld [vmem:[%s2799_s3 + $0x90] sm:$0xff]  }
  0x24   : > { %1963 = vmatpush3.bf16.msra.mxu1 %v2126_v8  ;;  %v2143_v25 = vld [vmem:[%s2799_s3 + $0x48] sm:$0xff]   ;;  %v2147_v29 = vld [vmem:[%s2799_s3 + $0x40] sm:$0xff]   ;;  %v2151_v37 = vld [vmem:[%s2799_s3 + $0x178] sm:$0xff]  }
  0x25   : > { %1964 = vmatprep.subr.bf16.mxu1 %v2129_v11  ;;  %v2144_v26 = vld [vmem:[%s2799_s3 + $0x8] sm:$0xff]   ;;  %v2148_v30 = vld [vmem:[%s2799_s3] sm:$0xff]   ;;  %v581_v38 = vld [vmem:[%s2520_s20 + $0x18] sm:$0xff] }
  0x26   : > { %1943 = vmatpush3.bf16.msra.mxu0 %v2128_v10  ;;  %v2145_v27 = vld [vmem:[%s2799_s3 + $0xc8] sm:$0xff]   ;;  %v2149_v31 = vld [vmem:[%s2799_s3 + $0xc0] sm:$0xff]   ;;  %v593_v39 = vpack.c.bf16 %v581_v38, %v581_v38  ;;  %v2152_v40 = vld [vmem:[%s2799_s3 + $0x138] sm:$0xff]  }
  0x27   : > { %1944 = vmatprep.subr.bf16.mxu0 %v2131_v13  ;;  %v2146_v28 = vld [vmem:[%s2799_s3 + $0x88] sm:$0xff]   ;;  %v2150_v34 = vld [vmem:[%s2799_s3 + $0x80] sm:$0xff]   ;;  %v580_v41 = vld [vmem:[%s2520_s20 + $0x10] sm:$0xff] }
  0x28   : > { %1965 = vmatpush3.bf16.msra.mxu1 %v2130_v12  ;;  %v579_v32 = vld [vmem:[%s2520_s20 + $0x8] sm:$0xff]  ;;  %v578_v35 = vld [vmem:[%s2520_s20] sm:$0xff]  ;;  %1307 = vmatprep.mubr.bf16.mxu1 %v593_v39  ;;  %v592_v42 = vpack.c.bf16 %v580_v41, %v580_v41  ;;  %v2153_v43 = vld [vmem:[%s2799_s3 + $0x1f8] sm:$0xff]  }
  0x29   : > { %1966 = vmatprep.subr.bf16.mxu1 %v2133_v15  ;;  %v591_v33 = vpack.c.bf16 %v579_v32, %v579_v32  ;;  %v590_v36 = vpack.c.bf16 %v578_v35, %v578_v35  ;;  %v2154_v44 = vld [vmem:[%s2799_s3 + $0x1b8] sm:$0xff]   ;;  %v2155_v45 = vld [vmem:[%s2799_s3 + $0x170] sm:$0xff]   ;;  %v2159_v49 = vld [vmem:[%s2799_s3 + $0x168] sm:$0xff]  }
  0x2a   : > { %1945 = vmatpush3.bf16.msra.mxu0 %v2132_v14  ;;  %v2156_v46 = vld [vmem:[%s2799_s3 + $0x130] sm:$0xff]   ;;  %v2160_v50 = vld [vmem:[%s2799_s3 + $0x128] sm:$0xff]   ;;  %v2163_v53 = vld [vmem:[%s2799_s3 + $0x160] sm:$0xff]  }
  0x2b   : > { %1946 = vmatprep.subr.bf16.mxu0 %v2135_v17  ;;  %1267 = vmatprep.mubr.bf16.mxu0 %v591_v33  ;;  %v2157_v47 = vld [vmem:[%s2799_s3 + $0x1f0] sm:$0xff]   ;;  %v2161_v51 = vld [vmem:[%s2799_s3 + $0x1e8] sm:$0xff]   ;;  %v2164_v54 = vld [vmem:[%s2799_s3 + $0x120] sm:$0xff]  }
  0x2c   : > { %1967 = vmatpush3.bf16.msra.mxu1 %v2134_v16  ;;  %v2158_v48 = vld [vmem:[%s2799_s3 + $0x1b0] sm:$0xff]   ;;  %v2162_v52 = vld [vmem:[%s2799_s3 + $0x1a8] sm:$0xff]   ;;  %v2165_v55 = vld [vmem:[%s2799_s3 + $0x1e0] sm:$0xff]  }
  0x2d   : > { %1968 = vmatprep.subr.bf16.mxu1 %v2137_v19  ;;  %v2166_v56 = vld [vmem:[%s2799_s3 + $0x1a0] sm:$0xff]   ;;  %v2167_v57 = vld [vmem:[%s2799_s3 + $0x158] sm:$0xff]   ;;  %v2171_v61 = vld [vmem:[%s2799_s3 + $0x150] sm:$0xff]  }
  0x2e   : > { %1947 = vmatpush3.bf16.msra.mxu0 %v2136_v18  ;;  %v2168_v58 = vld [vmem:[%s2799_s3 + $0x118] sm:$0xff]   ;;  %v2172_v62 = vld [vmem:[%s2799_s3 + $0x110] sm:$0xff]   ;;  %v2175_v1 = vld [vmem:[%s2799_s3 + $0x148] sm:$0xff]  }
  0x2f   : > { %1948 = vmatprep.subr.bf16.mxu0 %v2139_v21  ;;  %v2169_v59 = vld [vmem:[%s2799_s3 + $0x1d8] sm:$0xff]   ;;  %v2173_v63 = vld [vmem:[%s2799_s3 + $0x1d0] sm:$0xff]   ;;  %v2176_v2 = vld [vmem:[%s2799_s3 + $0x108] sm:$0xff]  }
  0x30   : > { %1969 = vmatpush3.bf16.msra.mxu1 %v2138_v20  ;;  %v2170_v60 = vld [vmem:[%s2799_s3 + $0x198] sm:$0xff]   ;;  %v2174_v0 = vld [vmem:[%s2799_s3 + $0x190] sm:$0xff]   ;;  %v2177_v4 = vld [vmem:[%s2799_s3 + $0x1c8] sm:$0xff]  }
  0x31   : > { %1970 = vmatprep.subr.bf16.mxu1 %v2141_v23  ;;  %v2178_v5 = vld [vmem:[%s2799_s3 + $0x188] sm:$0xff]   ;;  %v2179_v6 = vld [vmem:[%s2799_s3 + $0x140] sm:$0xff]   ;;  %v585_v14 = vld [vmem:[%s2520_s20 + $0x38] sm:$0xff] }
  0x32   : > { %1949 = vmatpush3.bf16.msra.mxu0 %v2140_v22  ;;  %v2180_v7 = vld [vmem:[%s2799_s3 + $0x100] sm:$0xff]   ;;  %v583_v9 = vld [vmem:[%s2520_s20 + $0x28] sm:$0xff]  ;;  %v597_v15 = vpack.c.bf16 %v585_v14, %v585_v14  ;;  %v2183_v16 = vld [vmem:[%s2799_s3 + $0x238] sm:$0xff]   ;;  %v2286_v14 = vmov 0.0  }
  0x33   : > { %1950 = vmatprep.subr.bf16.mxu0 %v2143_v25  ;;  %v2181_v8 = vld [vmem:[%s2799_s3 + $0x1c0] sm:$0xff]   ;;  %v595_v10 = vpack.c.bf16 %v583_v9, %v583_v9  ;;  %v584_v17 = vld [vmem:[%s2520_s20 + $0x30] sm:$0xff]  ;;  %v2185_v20 = vld [vmem:[%s2799_s3 + $0x228] sm:$0xff]  }
  0x34   : > { %1971 = vmatpush3.bf16.msra.mxu1 %v2142_v24  ;;  %v2182_v11 = vld [vmem:[%s2799_s3 + $0x180] sm:$0xff]   ;;  %v596_v18 = vpack.c.bf16 %v584_v17, %v584_v17  ;;  %v2184_v19 = vld [vmem:[%s2799_s3 + $0x230] sm:$0xff]   ;;  %v587_v22 = vld [vmem:[%s2520_s20 + $0x48] sm:$0xff] }
  0x35   : > { %1972 = vmatprep.subr.bf16.mxu1 %v2145_v27  ;;  %v582_v12 = vld [vmem:[%s2520_s20 + $0x20] sm:$0xff]  ;;  %v2187_v23 = vld [vmem:[%s2799_s3 + $0x218] sm:$0xff]   ;;  %v599_v24 = vpack.c.bf16 %v587_v22, %v587_v22  ;;  %v2189_v27 = vld [vmem:[%s2799_s3 + $0x208] sm:$0xff]  }
  0x36   : > { %1951 = vmatpush3.bf16.msra.mxu0 %v2144_v26  ;;  %v594_v13 = vpack.c.bf16 %v582_v12, %v582_v12  ;;  %v2186_v21 = vld [vmem:[%s2799_s3 + $0x220] sm:$0xff]   ;;  %v2188_v26 = vld [vmem:[%s2799_s3 + $0x210] sm:$0xff]   ;;  %v2195_v33 = vld [vmem:[%s2799_s3 + $0x248] sm:$0xff]  }
  0x37   : > { %1952 = vmatprep.subr.bf16.mxu0 %v2147_v29  ;;  %v589_v25 = vld [vmem:[%s576_s16] sm:$0xff]  ;;  %v2191_v29 = vld [vmem:[%s2799_s3 + $0x268] sm:$0xff]   ;;  %v2194_v32 = vld [vmem:[%s2799_s3 + $0x250] sm:$0xff]   ;;  %s1935_s16 = sshll.u32 %s2275_s21, 7  ;;  %s2213_s21 = scalar_lea.vmem %s2212_s15, 256 }
  0x38   : > { %1973 = vmatpush3.bf16.msra.mxu1 %v2146_v28  ;;  %1437 = vperm.xlu0 %2118, %v589_v25   ;;  %v2190_v28 = vld [vmem:[%s2799_s3 + $0x200] sm:$0xff]   ;;  %v2199_v25 = vld [vmem:[%s2805_s9 + $0x8] sm:$0xff]  }
  0x39   : > { %1974 = vmatprep.subr.bf16.mxu1 %v2149_v31  ;;  %v2193_v31 = vld [vmem:[%s2799_s3 + $0x258] sm:$0xff]   ;;  %v586_v35 = vld [vmem:[%s2520_s20 + $0x40] sm:$0xff]  ;;  %s2833_s20 = sld [smem:[#allocation14_spill]] }
  0x3a   : > { %1953 = vmatpush3.bf16.msra.mxu0 %v2148_v30  ;;  %v2192_v30 = vld [vmem:[%s2799_s3 + $0x260] sm:$0xff]  }
  0x3b   : > { %1982 = vmatprep.subr.bf16.mxu0 %v2151_v37  ;;  %v1838_v38 = vld [vmem:[%s2800_s4] ss:$0 sm:$0xff] }
  0x3c   : > { %1975 = vmatpush3.bf16.msra.mxu1 %v2150_v34  ;;  %v2196_v34 = vld [vmem:[%s2799_s3 + $0x240] sm:$0xff]  }
  0x3d   : > { %1268 = vmatmul.mubr.bf16.vlgmr.msra.gmra.mxu0 %v590_v36  ;;  %2004 = vmatprep.subr.bf16.mxu1 %v2153_v43  ;;  %v598_v36 = vpack.c.bf16 %v586_v35, %v586_v35  ;;  %v1919_v22 = vld [vmem:[%s2802_s6] ss:$0 sm:$0xff] }
  0x3e   : > { %1983 = vmatpush3.bf16.msra.mxu0 %v2152_v40  ;;  %1347 = vmatprep.mubr.bf16.mxu0 %v595_v10 }
  0x3f   : > { %1308 = vmatmul.mubr.bf16.vlgmr.msra.gmra.mxu1 %v592_v42  ;;  %1984 = vmatprep.subr.bf16.mxu0 %v2155_v45  ;;  %s2834_s0 = smov %s2833_s20  ;;  %s1720_s1 = scalar_lea.hbm %s2833_s20, %s1935_s16 }
  0x40   : > { %2005 = vmatpush3.bf16.msra.mxu1 %v2154_v44  ;;  %1387 = vmatprep.mubr.bf16.mxu1 %v597_v15  ;;  %v2198_v15 = vld [vmem:[%s2803_s7] sm:$0xff]  }
  0x41   : > { %2006 = vmatprep.subr.bf16.mxu1 %v2157_v47 }
  0x42   : > { %1985 = vmatpush3.bf16.msra.mxu0 %v2156_v46 }
  0x43   : > { %1986 = vmatprep.subr.bf16.mxu0 %v2159_v49 }
  0x44   : > { %2007 = vmatpush3.bf16.msra.mxu1 %v2158_v48 }
  0x45   : > { %2008 = vmatprep.subr.bf16.mxu1 %v2161_v51 }
  0x46   : > { %1987 = vmatpush3.bf16.msra.mxu0 %v2160_v50 }
  0x47   : > { %1988 = vmatprep.subr.bf16.mxu0 %v2163_v53 }
  0x48   : > { %2009 = vmatpush3.bf16.msra.mxu1 %v2162_v52 }
  0x49   : > { %2010 = vmatprep.subr.bf16.mxu1 %v2165_v55 }
  0x4a   : > { %1989 = vmatpush3.bf16.msra.mxu0 %v2164_v54 }
  0x4b   : > { %1990 = vmatprep.subr.bf16.mxu0 %v2167_v57 }
  0x4c   : > { %2011 = vmatpush3.bf16.msra.mxu1 %v2166_v56 }
  0x4d   : > { %2012 = vmatprep.subr.bf16.mxu1 %v2169_v59 }
  0x4e   : > { %1991 = vmatpush3.bf16.msra.mxu0 %v2168_v58 }
  0x4f   : > { %1992 = vmatprep.subr.bf16.mxu0 %v2171_v61 }
  0x50   : > { %2013 = vmatpush3.bf16.msra.mxu1 %v2170_v60 }
  0x51   : > { %2014 = vmatprep.subr.bf16.mxu1 %v2173_v63 }
  0x52   : > { %1993 = vmatpush3.bf16.msra.mxu0 %v2172_v62 }
  0x53   : > { %1994 = vmatprep.subr.bf16.mxu0 %v2175_v1 }
  0x54   : > { %2015 = vmatpush3.bf16.msra.mxu1 %v2174_v0  ;;  %v588_v0 = vld [vmem:[%s569_s24] sm:$0xff]  ;;  %s1834_s24 = sshll.u32 %s551_s17, 3 }
  0x55   : > { %2016 = vmatprep.subr.bf16.mxu1 %v2177_v4  ;;  %s553_s29 = scalar_lea.vmem [#allocation2], %s1834_s24 }
  0x56   : > { %1995 = vmatpush3.bf16.msra.mxu0 %v2176_v2  ;;  %s1722_s26 = sshll.u32 %s553_s29, 4  ;;  %s1723_s26 = int_to_ptr.vmem [resolvable:$true] %s1722_s26 }
  0x57   : > { %1996 = vmatprep.subr.bf16.mxu0 %v2179_v6  ;;  %s2207_s25 = scalar_lea.vmem %s1723_s26, 128  ;;  %p2214_p1 = scmp.lt.s32.totalorder %s1723_s26, %s2212_s15 }
  0x58   : > { %2017 = vmatpush3.bf16.msra.mxu1 %v2178_v5  ;;  %p2208_p12 = scmp.ne.s32.totalorder %s1723_s26, %s2207_s25  ;;  %p2215_p2 = scmp.lt.s32.totalorder %s2213_s21, %s2207_s25 }
  0x59   : > { %2018 = vmatprep.subr.bf16.mxu1 %v2181_v8 }
  0x5a   : > { %1997 = vmatpush3.bf16.msra.mxu0 %v2180_v7  ;;  %p2209_p13 = pnand %p2208_p12, %p2409_p4  ;;  %p2216_p3 = por %p2215_p2, %p2214_p1 }
  0x5b   : > { %1395 = vmatprep.subr.bf16.mxu0 %v2285_v3 }
  0x5c   : > { %2019 = vmatpush3.bf16.msra.mxu1 %v2182_v11  ;;  %p2210_p0 = pneg %p2209_p13 }
  0x5d   : > { %1348 = vmatmul.mubr.bf16.vlgmr.msra.gmra.mxu0 %v594_v13  ;;  %v2197_v13 = vld [vmem:[%s2803_s7 + $0x8] sm:$0xff]   ;;  %2035 = vmatprep.subr.bf16.mxu1 %v2286_v14 }
  0x5e   : > { %1396 = vmatpush1.bf16.msra.mxu0 %v2183_v16  ;;  %1917 = vmatprep.mubr.msk.bf16.mxu0 %vm1231_vm0, %v599_v24  ;;  %p2217_p5 = pnand %p2216_p3, %p2210_p0 }
  0x5f   : > { %1388 = vmatmul.mubr.bf16.vlgmr.msra.gmra.mxu1 %v596_v18  ;;  %1397 = vmatprep.subr.bf16.mxu0 %v2285_v3 }
  0x60   : > { %2036 = vmatpush3.bf16.msra.mxu1 %v2197_v13  ;;  %2039 = vmatprep.mubr.msk.bf16.mxu1 %vm2287_vm2, %v2286_v14 }
  0x61   : > { %2037 = vmatprep.subr.bf16.mxu1 %v2286_v14 }
  0x62   : > { %1398 = vmatpush1.bf16.msra.mxu0 %v2184_v19 }
  0x63   : > { %1399 = vmatprep.subr.bf16.mxu0 %v2285_v3 }
  0x64   : > { %2038 = vmatpush3.bf16.msra.mxu1 %v2198_v15 }
  0x65   : > { %2043 = vmatprep.subr.bf16.mxu1 %v2286_v14 }
  0x66   : > { %1400 = vmatpush1.bf16.msra.mxu0 %v2185_v20  ;;  %v1918_v20 = vld [vmem:[%s2801_s5] ss:$0 sm:$0xff] }
  0x67   : > { %1401 = vmatprep.subr.bf16.mxu0 %v2285_v3 }
  0x6a   : > { %1402 = vmatpush1.bf16.msra.mxu0 %v2186_v21 }
  0x6b   : > { %1403 = vmatprep.subr.bf16.mxu0 %v2285_v3 }
  0x6e   : > { %1404 = vmatpush1.bf16.msra.mxu0 %v2187_v23 }
  0x6f   : > { %1405 = vmatprep.subr.bf16.mxu0 %v2285_v3 }
  0x72   : > { %1406 = vmatpush1.bf16.msra.mxu0 %v2188_v26 }
  0x73   : > { %1407 = vmatprep.subr.bf16.mxu0 %v2285_v3 }
  0x76   : > { %1408 = vmatpush1.bf16.msra.mxu0 %v2189_v27  ;;  %v2200_v27 = vld [vmem:[%s2805_s9] sm:$0xff]  }
  0x77   : > { %1409 = vmatprep.subr.bf16.mxu0 %v2285_v3 }
  0x7a   : > { %1410 = vmatpush1.bf16.msra.mxu0 %v2190_v28  ;;  %v1920_v28 = vld [vmem:[%s2804_s8] ss:$0 sm:$0xff] }
  0x7b   : > { %1415 = vmatprep.subr.bf16.mxu0 %v2285_v3 }
  0x7e   : > { %1416 = vmatpush2.bf16.msra.mxu0 %v2191_v29 }
  0x7f   : > { %1417 = vmatprep.subr.bf16.mxu0 %v2285_v3 }
  0x82   : > { %1418 = vmatpush2.bf16.msra.mxu0 %v2192_v30 }
  0x83   : > { %1419 = vmatprep.subr.bf16.mxu0 %v2285_v3 }
  0x86   : > { %1420 = vmatpush2.bf16.msra.mxu0 %v2193_v31 }
  0x87   : > { %1421 = vmatprep.subr.bf16.mxu0 %v2285_v3 }
  0x8a   : > { %1422 = vmatpush2.bf16.msra.mxu0 %v2194_v32 }
  0x8b   : > { %1423 = vmatprep.subr.bf16.mxu0 %v2285_v3 }
  0x8e   : > { %1424 = vmatpush2.bf16.msra.mxu0 %v2195_v33 }
  0x8f   : > { %1425 = vmatprep.subr.bf16.mxu0 %v2285_v3 }
  0x92   : > { %1426 = vmatpush2.bf16.msra.mxu0 %v2196_v34  ;;  %v2201_v34 = vld [vmem:[%s2807_s11 + $0x8] sm:$0xff]  }
  0x95   : > { %1428 = vmatmul.mubr.bf16.vlgmr.msra.gmra.mxu0 %v598_v36 }
  0xb3   : > { %v1438_v62 = vpop.permute.xlu0 %1437 }
  0xfd   : > { %v1954_v37 = vpop.f32.mrf.mxu0 }
  0xff   : > { %v1955_v39 = vpop.f32.mrf.mxu0  ;;  %v1976_v41 = vpop.f32.mrf.mxu1 }
 0x100   : > { %v1956_v40 = vadd.f32 %v1955_v39, %v1954_v37  ;;  %v2202_v37 = vld [vmem:[%s2807_s11] sm:$0xff]  }
 0x101   : > { %v1957_v42 = vpop.f32.mrf.mxu0  ;;  %v1977_v44 = vpop.f32.mrf.mxu1 }
 0x102   : > { %v1270_v43 = vadd.f32 %v1956_v40, %v1838_v38  ;;  %v1978_v45 = vadd.f32 %v1977_v44, %v1976_v41  ;;  %v1924_v38 = vld [vmem:[%s2806_s10] ss:$0 sm:$0xff] }
 0x103   : > { %v1958_v46 = vpop.f32.mrf.mxu0  ;;  %v1979_v47 = vpop.f32.mrf.mxu1 }
 0x104   : > { %v1310_v48 = vadd.f32 %v1978_v45, %v1270_v43  ;;  %v1928_v46 = vld [vmem:[%s2808_s12] ss:$0 sm:$0xff] }
 0x105   : > { %v1980_v3 = vpop.f32.mrf.mxu1 }
 0x11d   : > { %v1998_v49 = vpop.f32.mrf.mxu0 }
 0x11f   : > { %v1999_v50 = vpop.f32.mrf.mxu0  ;;  %v2020_v51 = vpop.f32.mrf.mxu1 }
 0x120   : > { %v2000_v57 = vadd.f32 %v1999_v50, %v1998_v49 }
 0x121   : > { %v2001_v52 = vpop.f32.mrf.mxu0  ;;  %v2021_v53 = vpop.f32.mrf.mxu1 }
 0x122   : > { %v1350_v58 = vadd.f32 %v2000_v57, %v1310_v48  ;;  %v2022_v59 = vadd.f32 %v2021_v53, %v2020_v51 }
 0x123   : > { %v2002_v54 = vpop.f32.mrf.mxu0  ;;  %v2023_v55 = vpop.f32.mrf.mxu1 }
 0x124   : > { %v1390_v60 = vadd.f32 %v2022_v59, %v1350_v58 }
 0x125   : > { %v2024_v56 = vpop.f32.mrf.mxu1 }
 0x155   : > { %v1429_v61 = vpop.f32.mrf.mxu0 }
 0x156   : > { %v1430_v63 = vadd.f32 %v1429_v61, %v1390_v60 }
 0x157   : > { %v1431_v1 = vpop.f32.mrf.mxu0 }
 0x158   : > { %v1440_v2 = vmul.f32 %v1438_v62, %v1430_v63  ;;  %v1932_v62 = vld [vmem:[%s2809_s13] ss:$0 sm:$0xff] }
 0x159   : > { %v1432_v4 = vpop.f32.mrf.mxu0 }
 0x15a   : > { %v1441_v5 = vadd.f32 %v1440_v2, %v588_v0  ;;  %v1933_v0 = vld [vmem:[%s2810_s14] ss:$0 sm:$0xff] }
 0x15b   : > { %v1433_v6 = vpop.f32.mrf.mxu0 }
 0x15c   : > { %v1445_v7 = vsel %vm1444_vm1, %v1441_v5, 0.0 }
 0x15d   : > { %1446 = vadd.xlane.f32.xlu0 %v1445_v7 }
 0x1e6   : > { %v1447_v8 = vpop.xlane.xlu0 %1446 }
 0x1e7   : > { %v1449_v9 = vmul.f32 0.03125, %v1447_v8 }
 0x1e9   : > { %v1450_v10 = vsub.f32 %v1441_v5, %v1449_v9 }
 0x1eb   : > { %v1451_v11 = vmul.f32 %v1450_v10, %v1450_v10 }
 0x1ed   : > { %v1452_v12 = vsel %vm1444_vm1, %v1451_v11, 0.0 }
 0x1ee   : > { %1453 = vadd.xlane.f32.xlu1 %v1452_v12 }
 0x277   : > { %v1454_v16 = vpop.xlane.xlu1 %1453 }
 0x278   : > { %v1455_v17 = vmul.f32 0.03125, %v1454_v16 }
 0x27a   : > { %v1456_v18 = vadd.f32 1e-05, %v1455_v17 }
 0x27c   : > { %2203 = vrsqrt.f32 %v1456_v18 }
 0x289   : > { %v2204_v19 = vpop.eup %2203 }
 0x28a   : > { %v1458_v21 = vmul.f32 %v2204_v19, %v1450_v10 }
 0x28c   : > { %v1465_v23 = vmul.f32 %v1918_v20, %v1458_v21 }
 0x28e   : > { %v1472_v24 = vadd.f32 %v1919_v22, %v1465_v23 }
 0x290   : > { %v1473_v26 = vpack.c.bf16 %v1472_v24, %v1472_v24 }
 0x292   : > { %2040 = vmatmul.mubr.msk.bf16.vlgmr.msra.gmra.mxu1 %vm1444_vm1, %v1473_v26 }
 0x293   : > { %2044 = vmatpush3.bf16.msra.mxu1 %v2199_v25  ;;  %2047 = vmatprep.mubr.msk.bf16.mxu1 %vm2287_vm2, %v2286_v14 }
 0x294   : > { %2045 = vmatprep.subr.bf16.mxu1 %v2286_v14 }
 0x297   : > { %2046 = vmatpush3.bf16.msra.mxu1 %v2200_v27 }
 0x298   : > { %2051 = vmatprep.subr.bf16.mxu1 %v2286_v14 }
 0x352   : > { %v1534_v29 = vpop.f32.mrf.mxu1 }
 0x353   : > { %v1535_v30 = vadd.f32 %v1920_v28, %v1534_v29 }
 0x354   : > { %v2041_v31 = vpop.f32.mrf.mxu1 }
 0x355   : > { %v1540_v32 = vmax.f32 %v1535_v30, 0.0 }
 0x356   : > { %v1537_v33 = vpop.f32.mrf.mxu1 }
 0x357   : > { %v1541_v35 = vpack.c.bf16 %v1540_v32, %v1540_v32 }
 0x358   : > { %v2042_v36 = vpop.f32.mrf.mxu1 }
 0x359   : > { %2048 = vmatmul.mubr.msk.bf16.vlgmr.msra.gmra.mxu1 %vm1444_vm1, %v1541_v35 }
 0x35a   : > { %2052 = vmatpush3.bf16.msra.mxu1 %v2201_v34  ;;  %2055 = vmatprep.mubr.msk.bf16.mxu1 %vm2287_vm2, %v2286_v14 }
 0x35b   : > { %2053 = vmatprep.subr.bf16.mxu1 %v2286_v14 }
 0x35e   : > { %2054 = vmatpush3.bf16.msra.mxu1 %v2202_v37 }
 0x419   : > { %v1602_v39 = vpop.f32.mrf.mxu1 }
 0x41a   : > { %v1603_v40 = vadd.f32 %v1924_v38, %v1602_v39 }
 0x41b   : > { %v2049_v41 = vpop.f32.mrf.mxu1 }
 0x41c   : > { %v1608_v42 = vmax.f32 %v1603_v40, 0.0 }
 0x41d   : > { %v1605_v43 = vpop.f32.mrf.mxu1 }
 0x41e   : > { %v1609_v44 = vpack.c.bf16 %v1608_v42, %v1608_v42 }
 0x41f   : > { %v2050_v45 = vpop.f32.mrf.mxu1 }
 0x420   : > { %2056 = vmatmul.mubr.msk.bf16.vlgmr.msra.gmra.mxu1 %vm1444_vm1, %v1609_v44 }
 0x4e0   : > { %v1670_v47 = vpop.f32.mrf.mxu1 }
 0x4e1   : > { %v1671_v48 = vadd.f32 %v1928_v46, %v1670_v47 }
 0x4e2   : > { %v2057_v3 = vpop.f32.mrf.mxu1 }
 0x4e3   : > { %v1676_v49 = vadd.f32 %v1671_v48, %v1472_v24 }
 0x4e4   : > { %v1673_v50 = vpop.f32.mrf.mxu1 }
 0x4e5   : > { %v1679_v51 = vsel %vm1444_vm1, %v1676_v49, 0.0 }
 0x4e6   : > { %1680 = vadd.xlane.f32.xlu1 %v1679_v51  ;;  %v2058_v52 = vpop.f32.mrf.mxu1 }
 0x56f   : > { %v1681_v53 = vpop.xlane.xlu1 %1680 }
 0x570   : > { %v1682_v54 = vmul.f32 0.03125, %v1681_v53 }
 0x572   : > { %v1683_v55 = vsub.f32 %v1676_v49, %v1682_v54 }
 0x574   : > { %v1684_v56 = vmul.f32 %v1683_v55, %v1683_v55 }
 0x576   : > { %v1685_v57 = vsel %vm1444_vm1, %v1684_v56, 0.0 }
 0x577   : > { %1686 = vadd.xlane.f32.xlu1 %v1685_v57 }
 0x600   : > { %v1687_v58 = vpop.xlane.xlu1 %1686 }
 0x601   : > { %v1688_v59 = vmul.f32 0.03125, %v1687_v58 }
 0x603   : > { %v1689_v60 = vadd.f32 1e-05, %v1688_v59 }
 0x605   : > { %2205 = vrsqrt.f32 %v1689_v60 }
 0x612   : > { %v2206_v61 = vpop.eup %2205 }
 0x613   : > { %v1691_v63 = vmul.f32 %v2206_v61, %v1683_v55 }
 0x615   : > { %v1698_v1 = vmul.f32 %v1932_v62, %v1691_v63 }
 0x617   : > { %v1705_v2 = vadd.f32 %v1933_v0, %v1698_v1 }
 0x619   : > { %1706 = vst.msk [vmem:[%s553_s29] sm:$0xff] %vm1444_vm1, %v1705_v2 }
 0x61a   : > { %2220 = shalt.err (!%p2217_p5)
}
 0x61b   : > { %s2221_s24 = scalar_lea.hbm %s1720_s1, 128  ;;  %s2225_s16 = scalar_lea.hbm %s2834_s0, 256 }
 0x61c   : > { %p2222_p6 = scmp.ne.s32.totalorder %s1720_s1, %s2221_s24  ;;  %p2226_p10 = scmp.lt.s32.totalorder %s1720_s1, %s2834_s0 }
 0x61d   : > { %p2227_p11 = scmp.lt.s32.totalorder %s2225_s16, %s2221_s24 }
 0x61e   : > { %p2223_p7 = pnand %p2222_p6, %p2409_p4 }
 0x61f   : > { %p2228_p12 = por %p2227_p11, %p2226_p10 }
 0x620   : > { %p2224_p9 = pneg %p2223_p7 }
 0x622   : > { %p2229_p13 = pnand %p2228_p12, %p2224_p9 }
 0x624   : > { %2232 = shalt.err (!%p2229_p13)
}
 0x625   : > { %2060 = dma.vmem_to_hbm [thread:$0]  (%p2409_p4), %s1723_s26, 128, %s1720_s1, %s1708_s2  }
 0x626 PF: > { %s2835_s18 = sld [smem:[#allocation5_spill]]  ;;  %p2066_p0 = scmp.ge.s32.totalorder %s2283_s23, 2 }
 0x628   : > { %p2063_p1 = pnand %p2066_p0, %p2416_p8 }
 0x62a   : > { %p2064_p2 = pneg %p2063_p1 }
 0x62c   : > { %s1734_s25 = sand.u32 1, %s2835_s18  }
 0x62d   : > { %s1735_s27 = scalar_lea.sflag [#allocation3], %s1734_s25 }
 0x62e   : > { %2258 = dma.done.wait (%p2064_p2), %s1735_s27, 128  }
 0x62f   : > { %2260 = vsyncadd (%p2064_p2), %s1735_s27, 4294967168  ;;  %s28_s23 = sadd.s32 1, %s2283_s23   ;;  %s2837_s15 = sld [smem:[#allocation6_spill]] }
 0x630   : > { %p25_p3 = scmp.ge.s32.totalorder %s28_s23, 4   ;;  %s2838_s20 = sld [smem:[#allocation10_spill]] }
 0x631   : > { %s2839_s21 = sld [smem:[#allocation7_spill]]  ;;  %s2841_s18 = smov %s2267_s19 }
 0x632   : > { %s2840_s22 = sld [smem:[#allocation8_spill]]  ;;  %27 = sbr.rel (!%p25_p3) target bundleno = 9 (0x9), region = 121 }
 0x635   : > { %s2842_s19 = smov %s2837_s15 }
 0x637   :  { %1740 = vsyncpa [#allocation3], 1 }
 0x638   :  { %1742 = vsyncpa [#allocation3 + $0x1], 1 }

</bundles_post_ra>
